<compile_context>
chip_gen: v7x
topology: tpu7x:2x2x1
jax: 0.10.0
libtpu: 0.0.40
codegen_flags: <defaults>
</compile_context>

<pallas_src>
import functools

import jax
import jax.numpy as jnp
from jax.experimental import pallas as pl
from jax.experimental.pallas import tpu as pltpu

_NEG_SLOPE = 0.01  # torch.nn.LeakyReLU default


def _cembedder_kernel(x_ref, w1_ref, b1_ref, w2_ref, b2_ref, out_ref, *, negative_slope):
    # x_ref  : (TI, B, 1)   per-feature input scalars for this tile of features
    # w1_ref : (TI, 1, H)   stacked fc1 weights
    # b1_ref : (TI, 1, H)   stacked fc1 biases
    # w2_ref : (TI, H, E)   stacked fc2 weights (pre-transposed: h @ w2 + b2)
    # b2_ref : (TI, 1, E)   stacked fc2 biases
    # out_ref: (TI, B, E)
    h = x_ref[...] * w1_ref[...] + b1_ref[...]            # (TI, B, H)  broadcast FMA
    h = jnp.where(h >= 0, h, h * negative_slope)          # LeakyReLU
    # Batched matmul over the feature tile: (TI, B, H) x (TI, H, E) -> (TI, B, E)
    acc = jnp.einsum("ibh,ihe->ibe", h, w2_ref[...],
                     preferred_element_type=jnp.float32)
    out_ref[...] = (acc + b2_ref[...]).astype(out_ref.dtype)


def _pick_feature_tile(in_dim, h, e, itemsize=4, target_bytes=2 << 20):
    """Largest divisor of in_dim whose W2 block stays <= target_bytes; keep at
    least 2 grid steps (when possible) so the BlockSpec pipeline overlaps."""
    best = 1
    for ti in range(1, in_dim + 1):
        if in_dim % ti == 0 and ti * h * e * itemsize <= target_bytes:
            best = ti
    if best == in_dim and in_dim > 1:
        for ti in range(in_dim // 2, 0, -1):
            if in_dim % ti == 0:
                return ti
    return best


def cembedder_l(x, w1, b1, w2, b2, *, negative_slope=_NEG_SLOPE, feature_tile=None):
    """Pallas forward of CEmbedder_L.

    x  : (B, in_dim)      (any (B, ...) shape flattening to in_dim, like the torch reshape)
    w1 : (in_dim, H)      = stack_i fc1_l[i].weight.reshape(H),  H = embed_dim // 2
    b1 : (in_dim, H)      = stack_i fc1_l[i].bias
    w2 : (in_dim, H, E)   = stack_i fc2_l[i].weight.T,           E = embed_dim
    b2 : (in_dim, E)      = stack_i fc2_l[i].bias
    returns (B, in_dim, E) -- same as the PyTorch module.
    """
    B = x.shape[0]
    x = x.reshape(B, -1)
    in_dim = x.shape[1]
    H = w1.shape[1]
    E = w2.shape[2]
    assert w1.shape == (in_dim, H) and b1.shape == (in_dim, H)
    assert w2.shape == (in_dim, H, E) and b2.shape == (in_dim, E)

    if feature_tile is None:
        feature_tile = _pick_feature_tile(in_dim, H, E, jnp.dtype(x.dtype).itemsize)
    assert in_dim % feature_tile == 0, (in_dim, feature_tile)
    ti = feature_tile
    grid = (in_dim // ti,)

    # Kernel-side layouts: tiled feature axis leading everywhere; trailing two
    # dims of every block equal the full array dims (valid for any tile size).
    x_k = jnp.transpose(x)[:, :, None]     # (in_dim, B, 1)
    w1_k = w1[:, None, :]                  # (in_dim, 1, H)
    b1_k = b1[:, None, :]                  # (in_dim, 1, H)
    b2_k = b2[:, None, :]                  # (in_dim, 1, E)

    kernel = functools.partial(_cembedder_kernel, negative_slope=negative_slope)
    out = pl.pallas_call(
        kernel,
        out_shape=jax.ShapeDtypeStruct((in_dim, B, E), x.dtype),
        grid_spec=pltpu.PrefetchScalarGridSpec(
            num_scalar_prefetch=0,
            grid=grid,
            in_specs=[
                pl.BlockSpec((ti, B, 1), lambda i: (i, 0, 0)),
                pl.BlockSpec((ti, 1, H), lambda i: (i, 0, 0)),
                pl.BlockSpec((ti, 1, H), lambda i: (i, 0, 0)),
                pl.BlockSpec((ti, H, E), lambda i: (i, 0, 0)),
                pl.BlockSpec((ti, 1, E), lambda i: (i, 0, 0)),
            ],
            out_specs=pl.BlockSpec((ti, B, E), lambda i: (i, 0, 0)),
        ),
        compiler_params=pltpu.CompilerParams(
            # Disjoint output tiles per grid step -> shard across TCs (v7x).
            dimension_semantics=("parallel",),
        ),
    )(x_k, w1_k, b1_k, w2, b2_k)

    # Layout plumbing back to the PyTorch output convention (B, in_dim, E).
    return jnp.transpose(out, (1, 0, 2))
    # TODO(synk): for sub-vreg-sized problems (e.g. B=1 decode) an XLA-fused
    # einsum is faster than any pallas_call launch; dispatch on size if needed.


def _reference(x, w1, b1, w2, b2, negative_slope=_NEG_SLOPE):
    """Plain-JAX mirror of the PyTorch per-feature loop."""
    B = x.shape[0]
    x = x.reshape(B, -1)
    outs = []
    for i in range(x.shape[1]):
        t = x[:, i:i + 1] * w1[i][None, :] + b1[i][None, :]   # Linear(1, H)
        t = jnp.where(t >= 0, t, negative_slope * t)          # LeakyReLU
        t = t @ w2[i] + b2[i][None, :]                        # Linear(H, E)
        outs.append(t[:, None, :])
    return jnp.concatenate(outs, axis=1)                      # (B, in_dim, E)


if __name__ == "__main__":
    # Small shapes consistent with the module: batch=2, in_dim=36 (default),
    # embed_dim=128 (keeps the output tile exactly lane-dense), H=64.
    B, in_dim, embed_dim = 2, 36, 128
    H = embed_dim // 2

    key = jax.random.PRNGKey(0)
    kx, k1, k2, k3, k4 = jax.random.split(key, 5)
    x = jax.random.normal(kx, (B, in_dim), dtype=jnp.float32)
    w1 = 0.5 * jax.random.normal(k1, (in_dim, H), dtype=jnp.float32)
    b1 = 0.1 * jax.random.normal(k2, (in_dim, H), dtype=jnp.float32)
    w2 = (1.0 / (H ** 0.5)) * jax.random.normal(k3, (in_dim, H, embed_dim), dtype=jnp.float32)
    b2 = 0.1 * jax.random.normal(k4, (in_dim, embed_dim), dtype=jnp.float32)

    out = cembedder_l(x, w1, b1, w2, b2)
    out = jax.block_until_ready(out)
    assert out.shape == (B, in_dim, embed_dim), out.shape

    ref = _reference(x, w1, b1, w2, b2)
    # Tolerance covers MXU multi-pass f32 matmul vs XLA-default-precision dots.
    assert jnp.allclose(out, ref, atol=1e-2, rtol=1e-2), float(jnp.max(jnp.abs(out - ref)))

    print("KERNEL_OK")
</pallas_src>

<mosaic_0001>
module attributes {stable_mosaic.version = 11 : i64} {
  func.func @_cembedder_kernel(%arg0: i32, %arg1: memref<18x2x1xf32, #tpu.memory_space<vmem>>, %arg2: memref<18x1x64xf32, #tpu.memory_space<vmem>>, %arg3: memref<18x1x64xf32, #tpu.memory_space<vmem>>, %arg4: memref<18x64x128xf32, #tpu.memory_space<vmem>>, %arg5: memref<18x1x128xf32, #tpu.memory_space<vmem>>, %arg6: memref<18x2x128xf32, #tpu.memory_space<vmem>>) attributes {dimension_semantics = [#tpu.dimension_semantics<parallel>], iteration_bounds = array<i64: 2>, scalar_prefetch = 0 : i64, scratch_operands = 0 : i64, tpu.core_type = #tpu.core_type<tc>, window_params = [{transform_indices = @transform_0, window_bounds = array<i64: 18, 2, 1>}, {transform_indices = @transform_1, window_bounds = array<i64: 18, 1, 64>}, {transform_indices = @transform_2, window_bounds = array<i64: 18, 1, 64>}, {transform_indices = @transform_3, window_bounds = array<i64: 18, 64, 128>}, {transform_indices = @transform_4, window_bounds = array<i64: 18, 1, 128>}, {transform_indices = @transform_5, window_bounds = array<i64: 18, 2, 128>}]} {
    %c0 = arith.constant 0 : index
    %c0_0 = arith.constant 0 : index
    %c0_1 = arith.constant 0 : index
    %0 = vector.load %arg1[%c0, %c0_0, %c0_1] : memref<18x2x1xf32, #tpu.memory_space<vmem>>, vector<18x2x1xf32>
    %c0_2 = arith.constant 0 : index
    %c0_3 = arith.constant 0 : index
    %c0_4 = arith.constant 0 : index
    %1 = vector.load %arg2[%c0_2, %c0_3, %c0_4] : memref<18x1x64xf32, #tpu.memory_space<vmem>>, vector<18x1x64xf32>
    %2 = vector.broadcast %0 : vector<18x2x1xf32> to vector<18x2x64xf32>
    %3 = vector.broadcast %1 : vector<18x1x64xf32> to vector<18x2x64xf32>
    %4 = arith.mulf %2, %3 : vector<18x2x64xf32>
    %c0_5 = arith.constant 0 : index
    %c0_6 = arith.constant 0 : index
    %c0_7 = arith.constant 0 : index
    %5 = vector.load %arg3[%c0_5, %c0_6, %c0_7] : memref<18x1x64xf32, #tpu.memory_space<vmem>>, vector<18x1x64xf32>
    %6 = vector.broadcast %5 : vector<18x1x64xf32> to vector<18x2x64xf32>
    %7 = arith.addf %4, %6 : vector<18x2x64xf32>
    %cst = arith.constant 0.000000e+00 : f32
    %8 = vector.broadcast %cst : f32 to vector<18x2x64xf32>
    %9 = arith.cmpf oge, %7, %8 : vector<18x2x64xf32>
    %cst_8 = arith.constant 0.00999999977 : f32
    %10 = vector.broadcast %cst_8 : f32 to vector<18x2x64xf32>
    %11 = arith.mulf %7, %10 : vector<18x2x64xf32>
    %12 = arith.select %9, %7, %11 : vector<18x2x64xi1>, vector<18x2x64xf32>
    %c0_9 = arith.constant 0 : index
    %c0_10 = arith.constant 0 : index
    %c0_11 = arith.constant 0 : index
    %13 = vector.load %arg4[%c0_9, %c0_10, %c0_11] : memref<18x64x128xf32, #tpu.memory_space<vmem>>, vector<18x64x128xf32>
    "tpu.trace_start"() <{level = 10 : i32, message = "ibh,ihe->ibe"}> : () -> ()
    %cst_12 = arith.constant dense<0.000000e+00> : vector<18x2x128xf32>
    %14 = tpu.matmul %12, %13, %cst_12 {dimension_numbers = #tpu.dot_dimension_numbers<[2], [1], [1], [2], [0, 0, 0, 1, 1, 2], [0], [0]>} : vector<18x2x64xf32>, vector<18x64x128xf32>, vector<18x2x128xf32> -> vector<18x2x128xf32>
    "tpu.trace_stop"() : () -> ()
    %c0_13 = arith.constant 0 : index
    %c0_14 = arith.constant 0 : index
    %c0_15 = arith.constant 0 : index
    %15 = vector.load %arg5[%c0_13, %c0_14, %c0_15] : memref<18x1x128xf32, #tpu.memory_space<vmem>>, vector<18x1x128xf32>
    %16 = vector.broadcast %15 : vector<18x1x128xf32> to vector<18x2x128xf32>
    %17 = arith.addf %14, %16 : vector<18x2x128xf32>
    %c0_16 = arith.constant 0 : index
    %c0_17 = arith.constant 0 : index
    %c0_18 = arith.constant 0 : index
    %18 = vector.load %arg6[%c0_16, %c0_17, %c0_18] : memref<18x2x128xf32, #tpu.memory_space<vmem>>, vector<18x2x128xf32>
    tpu.vector_store %arg6[%c0_16, %c0_17, %c0_18], %17 {strides = array<i32>} : memref<18x2x128xf32, #tpu.memory_space<vmem>>, vector<18x2x128xf32>,
    return
  }
  func.func @transform_0(%arg0: i32) -> (i32, i32, i32) {
    %c0_i32 = arith.constant 0 : i32
    %c0_i32_0 = arith.constant 0 : i32
    %c0_i32_1 = arith.constant 0 : i32
    return %arg0, %c0_i32, %c0_i32_0 : i32, i32, i32
  }
  func.func @transform_1(%arg0: i32) -> (i32, i32, i32) {
    %c0_i32 = arith.constant 0 : i32
    %c0_i32_0 = arith.constant 0 : i32
    %c0_i32_1 = arith.constant 0 : i32
    return %arg0, %c0_i32, %c0_i32_0 : i32, i32, i32
  }
  func.func @transform_2(%arg0: i32) -> (i32, i32, i32) {
    %c0_i32 = arith.constant 0 : i32
    %c0_i32_0 = arith.constant 0 : i32
    %c0_i32_1 = arith.constant 0 : i32
    return %arg0, %c0_i32, %c0_i32_0 : i32, i32, i32
  }
  func.func @transform_3(%arg0: i32) -> (i32, i32, i32) {
    %c0_i32 = arith.constant 0 : i32
    %c0_i32_0 = arith.constant 0 : i32
    %c0_i32_1 = arith.constant 0 : i32
    return %arg0, %c0_i32, %c0_i32_0 : i32, i32, i32
  }
  func.func @transform_4(%arg0: i32) -> (i32, i32, i32) {
    %c0_i32 = arith.constant 0 : i32
    %c0_i32_0 = arith.constant 0 : i32
    %c0_i32_1 = arith.constant 0 : i32
    return %arg0, %c0_i32, %c0_i32_0 : i32, i32, i32
  }
  func.func @transform_5(%arg0: i32) -> (i32, i32, i32) {
    %c0_i32 = arith.constant 0 : i32
    %c0_i32_0 = arith.constant 0 : i32
    %c0_i32_1 = arith.constant 0 : i32
    return %arg0, %c0_i32, %c0_i32_0 : i32, i32, i32
  }
}

</mosaic_0001>

<bundles_post_ra>
// kernel: tpu_custom_call.1
= control target key start
LH: loop header
LB: loop body
LE: loop exit
PB: predicated region body
PF: predicated region fallthrough
CT: control target
= control target key end

     0   :  { %s4412_s0 = inlined_call_operand.vmem [shape: f32[36,2,1], index: 0, kind: input, shape index: {}]   ;;  %s4413_s1 = inlined_call_operand.hbm [shape: f32[36,1,64], index: 1, kind: input, shape index: {}]   ;;  %s4414_s2 = inlined_call_operand.hbm [shape: f32[36,1,64], index: 2, kind: input, shape index: {}]   ;;  %s4415_s3 = inlined_call_operand.hbm [shape: f32[36,64,128], index: 3, kind: input, shape index: {}]   ;;  %s4416_s4 = inlined_call_operand.hbm [shape: f32[36,1,128], index: 4, kind: input, shape index: {}]   ;;  %s4417_s5 = inlined_call_operand.hbm [shape: f32[36,2,128], index: 5, kind: output, shape index: {}]  }
   0x1   :  { %4427 = sst [smem:[#allocation18_spill]] %s4413_s1 }
   0x2   :  { %4428 = sst [smem:[#allocation19_spill]] %s4414_s2 }
   0x3   :  { %10 = vsyncpa [#allocation3], 0 }
   0x4   :  { %12 = vsyncpa [#allocation3 + $0x1], 0 }
   0x5   :  { %13 = vsyncpa [#allocation6], 0 }
   0x6   :  { %15 = vsyncpa [#allocation6 + $0x1], 0 }
   0x7   :  { %16 = vsyncpa [#allocation9], 0 }
   0x8   :  { %18 = vsyncpa [#allocation9 + $0x1], 0 }
   0x9   :  { %19 = vsyncpa [#allocation4], 0 }
   0xa   :  { %21 = vsyncpa [#allocation4 + $0x1], 0  ;;  %s3739_s18 = smov 0   ;;  %s3741_s19 = smov 0  }
   0xb   :  { %s3743_s20 = smov 0   ;;  %s3745_s21 = smov 0  }
   0xc LB: > { %4429 = sst [smem:[#allocation15_spill]] %s3688_s20  ;;  %s3760_s22 = sadd.s32 4294967295, %s3692_s21   ;;  %s3692_s21 = sphi %s3745_s21, %s4448_s21   ;;  %s3688_s20 = sphi %s3743_s20, %s4450_s20   ;;  %s3684_s19 = sphi %s3741_s19, %s4452_s19   ;;  %s3680_s18 = sphi %s3739_s18, %s4451_s18  }
   0xd   : > { %s2606_s23 = sadd.s32 4294967294, %s3692_s21   ;;  %s3764_s24 = sadd.s32 1, %s3692_s21  }
   0xe   : > { %4430 = sst [smem:[#allocation16_spill]] %s3764_s24  ;;  %s60_s25 = sadd.s32 1, %s3688_s20 }
   0xf   : > { %s57_s26 = ssub.s32 %s3692_s21, %s3764_s24  ;;  %p67_p0 = scmp.ne.s32.totalorder %s3688_s20, %s3684_s19 }
  0x10   : > { %p58_p1 = scmp.eq.s32.totalorder %s57_s26, 0  ;;  %p68_p2 = scmp.eq.s32.totalorder %s3692_s21, 0 }
  0x11   : > { %p73_p3 = scmp.ne.s32.totalorder %s3684_s19, %s3680_s18  ;;  %p74_p4 = scmp.eq.s32.totalorder %s3760_s22, 0 }
  0x12   : > { %s3776_s27 = scalar_select %p58_p1, %s3688_s20, %s60_s25  }
  0x13   : > { %p69_p5 = por %p68_p2, %p67_p0  ;;  %p3778_p6 = por %p74_p4, %p73_p3 }
  0x14   : > { %4431 = sst [smem:[#allocation17_spill]] %s3776_s27  ;;  %p175_p7 = scmp.eq.s32.totalorder %s3760_s22, 1 }
  0x15   : > { %s4432_s28 = scalar_select %p3778_p6, 1, 0 }
  0x16   : > { %p181_p8 = scmp.eq.s32.totalorder %s2606_s23, 1  ;;  %p3452_p10 = scmp.lt.s32.totalorder %s3692_s21, 2 }
  0x17   : > { %p3785_p11 = por %p175_p7, %p67_p0  ;;  %s3794_s6 = sand.u32 1, %s3688_s20  }
  0x18   : > { %p3789_p12 = por %p181_p8, %p73_p3  ;;  %s3797_s7 = smul.u32 288, %s3692_s21 }
  0x19   : > { %s4433_s29 = scalar_select %p3785_p11, 1, 0 }
  0x1a   : > { %s4434_s30 = scalar_select %p3789_p12, 1, 0 }
  0x1b   : > { %s3800_s8 = smul.u32 18, %s3794_s6  ;;  %p3802_p13 = pnand %p3452_p10, %p69_p5 }
  0x1c   : > { %s231_s10 = sand.u32 1, %s3692_s21   ;;  %s4436_s2 = sld [smem:[#allocation19_spill]] }
  0x1d   : > { %s235_s14 = scalar_lea.vmem [#allocation5], %s3800_s8  ;;  %s3817_s16 = scalar_lea.sflag [#allocation6], %s231_s10 }
  0x1e   : > { %s242_s15 = sshll.u32 %s235_s14, 4  ;;  %p3823_p2 = pneg %p3802_p13  ;;  %s3814_s15 = int_to_ptr.vmem [resolvable:$true] %s242_s15 }
  0x22   : > { %s3811_s13 = scalar_lea.hbm %s4436_s2, %s3797_s7  ;;  %s3503_s11 = scalar_lea.hbm %s4436_s2, 576 }
  0x23   : > { %s3498_s17 = scalar_lea.hbm %s3811_s13, 288  ;;  %p3504_p5 = scmp.lt.u32.totalorder %s3811_s13, %s4436_s2 }
  0x24   : > { %p3499_p1 = scmp.ne.s32.totalorder %s3811_s13, %s3498_s17  ;;  %p3505_p7 = scmp.lt.u32.totalorder %s3503_s11, %s3498_s17 }
  0x25   : > { %p3507_p10 = scmp.lt.u32.totalorder %s3498_s17, %s3811_s13 }
  0x26   : > { %p3501_p3 = pnand %p3823_p2, %p3499_p1  ;;  %p3506_p8 = por %p3505_p7, %p3504_p5 }
  0x28   : > { %p3502_p4 = pneg %p3501_p3  ;;  %p3508_p9 = por %p3507_p10, %p3506_p8 }
  0x2a   : > { %p3509_p0 = pnand %p3508_p9, %p3502_p4 }
  0x2c   : > { %3512 = shalt.err (!%p3509_p0)
}
  0x2d   : > { %s3513_s10 = scalar_lea.vmem %s3814_s15, 288  ;;  %s3694_s25 = smov [#allocation5]  }
  0x2e   : > { %p3514_p1 = scmp.ne.s32.totalorder %s3814_s15, %s3513_s10  ;;  %s3518_s26 = sshll.u32 %s3694_s25, 4  ;;  %s3519_s26 = int_to_ptr.vmem [resolvable:$false] %s3518_s26 }
  0x2f   : > { %s3520_s12 = scalar_lea.vmem %s3519_s26, 576  ;;  %p3521_p11 = scmp.lt.s32.totalorder %s3814_s15, %s3519_s26 }
  0x30   : > { %p3516_p3 = pnand %p3514_p1, %p3823_p2  ;;  %p3522_p6 = scmp.lt.s32.totalorder %s3520_s12, %s3513_s10 }
  0x32   : > { %p3517_p12 = pneg %p3516_p3  ;;  %p3523_p5 = por %p3522_p6, %p3521_p11 }
  0x34   : > { %p3524_p7 = pnand %p3523_p5, %p3517_p12 }
  0x36   : > { %3527 = shalt.err (!%p3524_p7)
}
  0x37   : > { %s4420_s17 = smov 16   ;;  %s4422_s11 = smov 1  }
  0x38   : > { %3441 = dma.hbm_to_vmem [thread:$0]  (!%p3802_p13), %s3811_s13, 288, %s3814_s15, %s3817_s16, %s4420_s17, %s4420_s17, %s4422_s11  }
  0x39   : > { %p293_p6 = scmp.lt.s32.totalorder %s3692_s21, 3  ;;  %s4438_s1 = sld [smem:[#allocation18_spill]] }
  0x3a   : > { %p4439_p9 = scmp.ge.s32.totalorder %s3692_s21, 1  ;;  %s214_s12 = scalar_lea.vmem [#allocation2], %s3800_s8 }
  0x3b   : > { %s221_s2 = sshll.u32 %s214_s12, 4  ;;  %s3420_s13 = smul.u32 1152, %s3794_s6  ;;  %s3864_s2 = int_to_ptr.vmem [resolvable:$true] %s221_s2 }
  0x3c   : > { %p3859_p11 = pnand %p4439_p9, %p293_p6  ;;  %s211_s15 = scalar_lea.sflag [#allocation3], %s3794_s6 }
  0x3e   : > { %s4440_s26 = scalar_select %p3859_p11, 1, 0 }
  0x3f   : > { %s3855_s25 = scalar_lea.hbm %s4438_s1, %s3797_s7  ;;  %s3533_s11 = scalar_lea.hbm %s4438_s1, 576 }
  0x40   : > { %s3528_s17 = scalar_lea.hbm %s3855_s25, 288  ;;  %p3534_p8 = scmp.lt.u32.totalorder %s3855_s25, %s4438_s1 }
  0x41   : > { %p3529_p12 = scmp.ne.s32.totalorder %s3855_s25, %s3528_s17  ;;  %p3535_p10 = scmp.lt.u32.totalorder %s3533_s11, %s3528_s17 }
  0x42   : > { %p3537_p3 = scmp.lt.u32.totalorder %s3528_s17, %s3855_s25 }
  0x43   : > { %p3531_p0 = pnand %p3529_p12, %p3823_p2  ;;  %p3536_p1 = por %p3535_p10, %p3534_p8 }
  0x45   : > { %p3532_p4 = pneg %p3531_p0  ;;  %p3538_p5 = por %p3537_p3, %p3536_p1 }
  0x47   : > { %p3539_p7 = pnand %p3538_p5, %p3532_p4 }
  0x49   : > { %3542 = shalt.err (!%p3539_p7)
}
  0x4a   : > { %s3543_s12 = scalar_lea.vmem %s3864_s2, 288  ;;  %s3697_s14 = smov [#allocation2]  }
  0x4b   : > { %p3544_p6 = scmp.ne.s32.totalorder %s3864_s2, %s3543_s12  ;;  %s3548_s10 = sshll.u32 %s3697_s14, 4  ;;  %s3549_s10 = int_to_ptr.vmem [resolvable:$false] %s3548_s10 }
  0x4c   : > { %s3550_s20 = scalar_lea.vmem %s3549_s10, 576  ;;  %p3551_p0 = scmp.lt.s32.totalorder %s3864_s2, %s3549_s10 }
  0x4d   : > { %p3546_p9 = pnand %p3544_p6, %p3823_p2  ;;  %p3552_p11 = scmp.lt.s32.totalorder %s3550_s20, %s3543_s12 }
  0x4f   : > { %p3547_p12 = pneg %p3546_p9  ;;  %p3553_p8 = por %p3552_p11, %p3551_p0 }
  0x51   : > { %p3554_p10 = pnand %p3553_p8, %p3547_p12 }
  0x53   : > { %3557 = shalt.err (!%p3554_p10)
}
  0x54   : > { %s4441_s27 = smov 1   ;;  %s4442_s17 = smov 16  }
  0x55   : > { %3438 = dma.hbm_to_vmem [thread:$0]  (!%p3802_p13), %s3855_s25, 288, %s3864_s2, %s211_s15, %s4442_s17, %s4442_s17, %s4441_s27  }
  0x56   : > { %s2697_s11 = smul.u32 18432, %s3692_s21  ;;  %s256_s14 = scalar_lea.vmem [#allocation7], %s3420_s13 }
  0x57   : > { %s264_s12 = sshll.u32 %s256_s14, 4  ;;  %s3563_s13 = scalar_lea.hbm %s4415_s3, 36864  ;;  %s3902_s12 = int_to_ptr.vmem [resolvable:$true] %s264_s12 }
  0x58   : > { %s3900_s1 = scalar_lea.hbm %s4415_s3, %s2697_s11 }
  0x59   : > { %s3558_s24 = scalar_lea.hbm %s3900_s1, 18432  ;;  %p3564_p3 = scmp.lt.u32.totalorder %s3900_s1, %s4415_s3 }
  0x5a   : > { %p3559_p11 = scmp.ne.s32.totalorder %s3900_s1, %s3558_s24  ;;  %p3565_p5 = scmp.lt.u32.totalorder %s3563_s13, %s3558_s24 }
  0x5b   : > { %p3567_p6 = scmp.lt.u32.totalorder %s3558_s24, %s3900_s1 }
  0x5c   : > { %p3561_p4 = pnand %p3559_p11, %p3823_p2  ;;  %p3566_p7 = por %p3565_p5, %p3564_p3 }
  0x5e   : > { %p3562_p1 = pneg %p3561_p4  ;;  %p3568_p9 = por %p3567_p6, %p3566_p7 }
  0x60   : > { %p3569_p12 = pnand %p3568_p9, %p3562_p1 }
  0x62   : > { %3572 = shalt.err (!%p3569_p12)
}
  0x63   : > { %s3573_s11 = scalar_lea.vmem %s3902_s12, 18432  ;;  %s3698_s10 = smov [#allocation7]  }
  0x64   : > { %p3574_p0 = scmp.ne.s32.totalorder %s3902_s12, %s3573_s11  ;;  %s3578_s20 = sshll.u32 %s3698_s10, 4  ;;  %s3579_s20 = int_to_ptr.vmem [resolvable:$false] %s3578_s20 }
  0x65   : > { %s3580_s2 = scalar_lea.vmem %s3579_s20, 36864  ;;  %p3581_p11 = scmp.lt.s32.totalorder %s3902_s12, %s3579_s20 }
  0x66   : > { %p3576_p8 = pnand %p3574_p0, %p3823_p2  ;;  %p3582_p4 = scmp.lt.s32.totalorder %s3580_s2, %s3573_s11 }
  0x68   : > { %p3577_p10 = pneg %p3576_p8  ;;  %p3583_p3 = por %p3582_p4, %p3581_p11 }
  0x6a   : > { %p3584_p5 = pnand %p3583_p3, %p3577_p10 }
  0x6c   : > { %3587 = shalt.err (!%p3584_p5)
}
  0x6d   : > { %s3699_s24 = smov 128   ;;  %s3700_s25 = smov 8  }
  0x6e   : > { %3444 = dma.hbm_to_vmem [thread:$0]  (!%p3802_p13), %s3900_s1, 18432, %s3902_s12, %s3817_s16, %s3699_s24, %s3699_s24, %s3700_s25  }
  0x6f   : > { %s3930_s14 = scalar_lea.hbm %s4416_s4, %s3797_s7  ;;  %s278_s11 = scalar_lea.vmem [#allocation8], %s3800_s8 }
  0x70   : > { %s285_s10 = sshll.u32 %s278_s11, 4  ;;  %s275_s20 = scalar_lea.sflag [#allocation9], %s3794_s6  ;;  %s3933_s10 = int_to_ptr.vmem [resolvable:$true] %s285_s10 }
  0x71   : > { %s3588_s2 = scalar_lea.hbm %s3930_s14, 288  ;;  %s3593_s12 = scalar_lea.hbm %s4416_s4, 576 }
  0x72   : > { %p3589_p1 = scmp.ne.s32.totalorder %s3930_s14, %s3588_s2  ;;  %p3594_p9 = scmp.lt.u32.totalorder %s3930_s14, %s4416_s4 }
  0x73   : > { %p3595_p12 = scmp.lt.u32.totalorder %s3593_s12, %s3588_s2  ;;  %p3597_p8 = scmp.lt.u32.totalorder %s3588_s2, %s3930_s14 }
  0x74   : > { %p3591_p7 = pnand %p3589_p1, %p3823_p2 }
  0x75   : > { %p3596_p0 = por %p3595_p12, %p3594_p9 }
  0x76   : > { %p3592_p6 = pneg %p3591_p7 }
  0x77   : > { %p3598_p10 = por %p3597_p8, %p3596_p0 }
  0x79   : > { %p3599_p11 = pnand %p3598_p10, %p3592_p6 }
  0x7b   : > { %3602 = shalt.err (!%p3599_p11)
}
  0x7c   : > { %s3603_s8 = scalar_lea.vmem %s3933_s10, 288  ;;  %s3701_s25 = smov [#allocation8]  }
  0x7d   : > { %p3604_p4 = scmp.ne.s32.totalorder %s3933_s10, %s3603_s8  ;;  %s3608_s13 = sshll.u32 %s3701_s25, 4  ;;  %s3609_s13 = int_to_ptr.vmem [resolvable:$false] %s3608_s13 }
  0x7e   : > { %s3610_s15 = scalar_lea.vmem %s3609_s13, 576  ;;  %p3611_p1 = scmp.lt.s32.totalorder %s3933_s10, %s3609_s13 }
  0x7f   : > { %p3606_p3 = pnand %p3604_p4, %p3823_p2  ;;  %p3612_p7 = scmp.lt.s32.totalorder %s3610_s15, %s3603_s8 }
  0x81   : > { %p3607_p5 = pneg %p3606_p3  ;;  %p3613_p9 = por %p3612_p7, %p3611_p1 }
  0x83   : > { %p3614_p12 = pnand %p3613_p9, %p3607_p5 }
  0x85   : > { %3617 = shalt.err (!%p3614_p12)
}
  0x86   : > { %3447 = dma.hbm_to_vmem [thread:$0]  (!%p3802_p13), %s3930_s14, 288, %s3933_s10, %s275_s20, %s4442_s17, %s4442_s17, %s4441_s27  }
  0x87   : > { %p4443_p2 = scmp.ne.s32.totalorder %s4440_s26, 0 }
  0x88   : > { %s3965_s23 = sand.u32 (!%p4443_p2), 1, %s3684_s19   ;;  %p4444_p6 = scmp.ne.s32.totalorder (!%p4443_p2), %s4432_s28, 0 }
  0x89   : > { %297 = sbr.rel (%p4443_p2) target bundleno = 657 (0x291), region = 40  ;;  %s300_s2 = scalar_lea.sflag (!%p4443_p2), [#allocation3], %s3965_s23 }
  0x8a   : > { %s3422_s11 = smul.u32 (!%p4443_p2), 18, %s3965_s23 }
  0x8c   : > { %s3969_s9 = scalar_lea.vmem (!%p4443_p2), [#allocation2], %s3422_s11 }
  0x90   : > { %3663 = dma.done.wait (%p4444_p6), %s300_s2, 288  }
  0x91   : > { %3665 = vsyncadd (%p4444_p6), %s300_s2, 4294967008  ;;  %s308_s6 = sand.u32 1, %s3760_s22   ;;  %s3976_s27 = scalar_lea.vmem [#allocation5], %s3422_s11 }
  0x92   : > { %s309_s26 = scalar_lea.sflag [#allocation6], %s308_s6 }
  0x93   : > { %3667 = dma.done.wait (%p4444_p6), %s309_s26, 18720  }
  0x94   : > { %3669 = vsyncadd (%p4444_p6), %s309_s26, 4294948576  ;;  %s3423_s17 = smul.u32 1152, %s3965_s23  ;;  %s327_s10 = scalar_lea.sflag [#allocation9], %s3965_s23 }
  0x95   : > { %s3986_s20 = scalar_lea.vmem [#allocation8], %s3422_s11 }
  0x96   : > { %s3983_s14 = scalar_lea.vmem [#allocation7], %s3423_s17 }
  0x97   : > { %3671 = dma.done.wait (%p4444_p6), %s327_s10, 288  }
  0x98   : > { %3673 = vsyncadd (%p4444_p6), %s327_s10, 4294967008  ;;  %s377_s1 = smul.u32 18, %s3760_s22  ;;  %v3702_v0 = vmov 0   ;;  %v3703_v1 = vmov 0.0|0.0   ;;  %v838_v2 = vld [vmem:[%s3983_s14] sm:$0xff]  ;;  %v839_v3 = vld [vmem:[%s3983_s14 + $0x8] sm:$0xff] }
  0x99   : > { %3497 = vset.pattern.permute.xlu1 %v3702_v0  ;;  %3496 = vset.pattern.permute.xlu0 %v3702_v0  ;;  %v3203_v6 = vpack.c.bf16 %v839_v3, %v838_v2  ;;  %v840_v9 = vld [vmem:[%s3983_s14 + $0x10] sm:$0xff]  ;;  %v841_v12 = vld [vmem:[%s3983_s14 + $0x18] sm:$0xff]  ;;  %v846_v13 = vld [vmem:[%s3983_s14 + $0x40] sm:$0xff]  ;;  %vm3704_vm0 = vmmov 0   ;;  %v3705_v21 = vmov 0.0   ;;  %vm1108_vm1 = vcmask 523264  }
  0x9a   : > { %p378_p13 = scmp.lt.s32.totalorder %s377_s1, 35  ;;  %3202 = vmatprep.subr.bf16.mxu0 %v3703_v1  ;;  %3214 = vmatprep.subr.bf16.mxu1 %v3703_v1  ;;  %v847_v14 = vld [vmem:[%s3983_s14 + $0x48] sm:$0xff]  ;;  %v3206_v15 = vpack.c.bf16 %v841_v12, %v840_v9  ;;  %v842_v17 = vld [vmem:[%s3983_s14 + $0x20] sm:$0xff]  ;;  %v848_v19 = vld [vmem:[%s3983_s14 + $0x50] sm:$0xff]  ;;  %s3424_s24 = smul.u32 36, %s3965_s23 }
  0x9b   : > { %3204 = vmatpush3.bf16.msra.mxu0 %v3203_v6  ;;  %v3215_v16 = vpack.c.bf16 %v847_v14, %v846_v13  ;;  %v843_v18 = vld [vmem:[%s3983_s14 + $0x28] sm:$0xff]  ;;  %v849_v20 = vld [vmem:[%s3983_s14 + $0x58] sm:$0xff]  ;;  %2876 = vmatprep.mubr.msk.f32.mxu0 %vm3704_vm0, %v3705_v21  ;;  %v844_v26 = vld [vmem:[%s3983_s14 + $0x30] sm:$0xff]  ;;  %s2696_s25 = smul.u32 576, %s3760_s22  ;;  %p4445_p8 = scmp.ne.s32.totalorder %s4433_s29, 0 }
  0x9c   : > { %s4454_s1 = smov (!%p378_p13, %s377_s1), 35  ;;  %3205 = vmatprep.subr.bf16.mxu0 %v3703_v1  ;;  %2895 = vmatprep.mubr.msk.f32.mxu1 %vm3704_vm0, %v3705_v21  ;;  %v3209_v24 = vpack.c.bf16 %v843_v18, %v842_v17  ;;  %v3218_v25 = vpack.c.bf16 %v849_v20, %v848_v19  ;;  %v845_v27 = vld [vmem:[%s3983_s14 + $0x38] sm:$0xff]  ;;  %v850_v28 = vld [vmem:[%s3983_s14 + $0x60] sm:$0xff]  ;;  %v851_v29 = vld [vmem:[%s3983_s14 + $0x68] sm:$0xff]  ;;  %s4324_s8 = scalar_lea.vmem [#allocation10], %s3424_s24 }
  0x9d   : > { %s2615_s16 = sshll.u32 %s4454_s1, 1  ;;  %3216 = vmatpush3.bf16.msra.mxu1 %v3215_v16  ;;  %v3212_v32 = vpack.c.bf16 %v845_v27, %v844_v26  ;;  %v3221_v33 = vpack.c.bf16 %v851_v29, %v850_v28  ;;  %v852_v34 = vld [vmem:[%s3983_s14 + $0x70] sm:$0xff]  ;;  %v853_v35 = vld [vmem:[%s3983_s14 + $0x78] sm:$0xff]  ;;  %v854_v49 = vld [vmem:[%s3983_s14 + $0x80] sm:$0xff]  ;;  %s2455_s13 = sshll.u32 %s4324_s8, 4  ;;  %s4367_s13 = int_to_ptr.vmem [resolvable:$true] %s2455_s13 }
  0x9e   : > { %s3998_s28 = scalar_lea.vmem %s4412_s0, %s2615_s16  ;;  %3217 = vmatprep.subr.bf16.mxu1 %v3703_v1  ;;  %v3224_v38 = vpack.c.bf16 %v853_v35, %v852_v34  ;;  %v2616_v45 = vld [vmem:[%s3969_s9] ss:$0 sm:$0xff]  ;;  %v2634_v46 = vld [vmem:[%s3976_s27] ss:$0 sm:$0xff]  ;;  %v2617_v52 = vld [vmem:[%s3969_s9 + $0x1] ss:$0 sm:$0xff]  ;;  %s4365_s2 = scalar_lea.hbm %s4417_s5, %s2696_s25 }
  0x9f   : > { %v390_v4 = vld [vmem:[%s3998_s28 + $0x4] sm:$0x3]  ;;  %v388_v5 = vld [vmem:[%s3998_s28] sm:$0x3]  ;;  %v391_v7 = vld [vmem:[%s3998_s28 + $0x6] sm:$0x3]  ;;  %3207 = vmatpush3.bf16.msra.mxu0 %v3206_v15 }
  0xa0   : > { %436 = vperm.xlu1 %3497, %v390_v4   ;;  %426 = vperm.xlu0 %3496, %v388_v5   ;;  %v389_v8 = vld [vmem:[%s3998_s28 + $0x2] sm:$0x3]  ;;  %v393_v10 = vld [vmem:[%s3998_s28 + $0xa] sm:$0x3]  ;;  %v392_v11 = vld [vmem:[%s3998_s28 + $0x8] sm:$0x3] }
  0xa1   : > { %v395_v22 = vld [vmem:[%s3998_s28 + $0xe] sm:$0x3]  ;;  %v394_v23 = vld [vmem:[%s3998_s28 + $0xc] sm:$0x3]  ;;  %3208 = vmatprep.subr.bf16.mxu0 %v3703_v1  ;;  %v397_v30 = vld [vmem:[%s3998_s28 + $0x12] sm:$0x3]  ;;  %3219 = vmatpush3.bf16.msra.mxu1 %v3218_v25 }
  0xa2   : > { %v396_v31 = vld [vmem:[%s3998_s28 + $0x10] sm:$0x3]  ;;  %3220 = vmatprep.subr.bf16.mxu1 %v3703_v1  ;;  %v399_v36 = vld [vmem:[%s3998_s28 + $0x16] sm:$0x3]  ;;  %v398_v37 = vld [vmem:[%s3998_s28 + $0x14] sm:$0x3] }
  0xa3   : > { %3210 = vmatpush3.bf16.msra.mxu0 %v3209_v24  ;;  %v401_v39 = vld [vmem:[%s3998_s28 + $0x1a] sm:$0x3]  ;;  %v400_v40 = vld [vmem:[%s3998_s28 + $0x18] sm:$0x3]  ;;  %v403_v41 = vld [vmem:[%s3998_s28 + $0x1e] sm:$0x3] }
  0xa4   : > { %441 = vperm.xlu1 %3497, %v391_v7   ;;  %431 = vperm.xlu0 %3496, %v389_v8   ;;  %v402_v42 = vld [vmem:[%s3998_s28 + $0x1c] sm:$0x3]  ;;  %v405_v43 = vld [vmem:[%s3998_s28 + $0x22] sm:$0x3]  ;;  %v404_v44 = vld [vmem:[%s3998_s28 + $0x20] sm:$0x3] }
  0xa5   : > { %3211 = vmatprep.subr.bf16.mxu0 %v3703_v1  ;;  %3222 = vmatpush3.bf16.msra.mxu1 %v3221_v33  ;;  %v855_v50 = vld [vmem:[%s3983_s14 + $0x88] sm:$0xff]  ;;  %v856_v59 = vld [vmem:[%s3983_s14 + $0x90] sm:$0xff]  ;;  %v857_v60 = vld [vmem:[%s3983_s14 + $0x98] sm:$0xff]  ;;  %s3618_s6 = scalar_lea.vmem %s4367_s13, 576  ;;  %s3706_s22 = smov [#allocation10]  }
  0xa6   : > { %3223 = vmatprep.subr.bf16.mxu1 %v3703_v1  ;;  %v2635_v55 = vld [vmem:[%s3976_s27 + $0x1] ss:$0 sm:$0xff]  ;;  %v3227_v56 = vpack.c.bf16 %v855_v50, %v854_v49  ;;  %v2618_v57 = vld [vmem:[%s3969_s9 + $0x2] ss:$0 sm:$0xff]  ;;  %v862_v62 = vld [vmem:[%s3983_s14 + $0xc0] sm:$0xff]  ;;  %v3230_v5 = vpack.c.bf16 %v857_v60, %v856_v59  ;;  %p3619_p0 = scmp.ne.s32.totalorder %s4367_s13, %s3618_s6  ;;  %s3622_s26 = sshll.u32 %s3706_s22, 4  ;;  %s3623_s26 = int_to_ptr.vmem [resolvable:$false] %s3622_s26 }
  0xa7   : > { %3213 = vmatpush3.bf16.msra.mxu0 %v3212_v32  ;;  %v863_v63 = vld [vmem:[%s3983_s14 + $0xc8] sm:$0xff]  ;;  %v2636_v3 = vld [vmem:[%s3976_s27 + $0x2] ss:$0 sm:$0xff]  ;;  %v858_v8 = vld [vmem:[%s3983_s14 + $0xa0] sm:$0xff]  ;;  %p3625_p4 = scmp.lt.s32.totalorder %s4367_s13, %s3623_s26 }
  0xa8   : > { %451 = vperm.xlu1 %3497, %v393_v10   ;;  %446 = vperm.xlu0 %3496, %v392_v11   ;;  %v3239_v7 = vpack.c.bf16 %v863_v63, %v862_v62  ;;  %v859_v9 = vld [vmem:[%s3983_s14 + $0xa8] sm:$0xff]  ;;  %v864_v10 = vld [vmem:[%s3983_s14 + $0xd0] sm:$0xff]  ;;  %v865_v11 = vld [vmem:[%s3983_s14 + $0xd8] sm:$0xff]  ;;  %p3620_p10 = pnand %p3619_p0, %p4445_p8 }
  0xa9   : > { %3226 = vmatprep.subr.bf16.mxu0 %v3703_v1  ;;  %3225 = vmatpush3.bf16.msra.mxu1 %v3224_v38  ;;  %v2619_v14 = vld [vmem:[%s3969_s9 + $0x3] ss:$0 sm:$0xff]  ;;  %v3233_v15 = vpack.c.bf16 %v859_v9, %v858_v8  ;;  %v3242_v16 = vpack.c.bf16 %v865_v11, %v864_v10  ;;  %v860_v17 = vld [vmem:[%s3983_s14 + $0xb0] sm:$0xff]  ;;  %v866_v20 = vld [vmem:[%s3983_s14 + $0xe0] sm:$0xff] }
  0xaa   : > { %3238 = vmatprep.subr.bf16.mxu1 %v3703_v1  ;;  %v861_v18 = vld [vmem:[%s3983_s14 + $0xb8] sm:$0xff]  ;;  %v870_v28 = vld [vmem:[%s3983_s14 + $0x100] sm:$0xff]  ;;  %v871_v29 = vld [vmem:[%s3983_s14 + $0x108] sm:$0xff]  ;;  %p3621_p11 = pneg %p3620_p10 }
  0xab   : > { %v2637_v25 = vld [vmem:[%s3976_s27 + $0x3] ss:$0 sm:$0xff]  ;;  %v3236_v26 = vpack.c.bf16 %v861_v18, %v860_v17  ;;  %v3251_v34 = vpack.c.bf16 %v871_v29, %v870_v28  ;;  %v878_v38 = vld [vmem:[%s3983_s14 + $0x140] sm:$0xff]  ;;  %v883_v60 = vld [vmem:[%s3983_s14 + $0x168] sm:$0xff] }
  0xac   : > { %461 = vperm.xlu1 %3497, %v395_v22   ;;  %456 = vperm.xlu0 %3496, %v394_v23   ;;  %v867_v22 = vld [vmem:[%s3983_s14 + $0xe8] sm:$0xff]  ;;  %v881_v49 = vld [vmem:[%s3983_s14 + $0x158] sm:$0xff]  ;;  %v2638_v50 = vld [vmem:[%s3976_s27 + $0x4] ss:$0 sm:$0xff] }
  0xad   : > { %v3245_v27 = vpack.c.bf16 %v867_v22, %v866_v20  ;;  %v882_v59 = vld [vmem:[%s3983_s14 + $0x160] sm:$0xff]  ;;  %v888_v10 = vld [vmem:[%s3983_s14 + $0x190] sm:$0xff]  ;;  %v889_v11 = vld [vmem:[%s3983_s14 + $0x198] sm:$0xff] }
  0xae   : > { %v2639_v62 = vld [vmem:[%s3976_s27 + $0x5] ss:$0 sm:$0xff]  ;;  %v3278_v18 = vpack.c.bf16 %v889_v11, %v888_v10  ;;  %v891_v22 = vld [vmem:[%s3983_s14 + $0x1a8] sm:$0xff]  ;;  %v2623_v28 = vld [vmem:[%s3969_s9 + $0x7] ss:$0 sm:$0xff] }
  0xaf   : > { %v890_v20 = vld [vmem:[%s3983_s14 + $0x1a0] sm:$0xff]  ;;  %v915_v11 = vld [vmem:[%s3983_s14 + $0x268] sm:$0xff] }
  0xb0   : > { %471 = vperm.xlu1 %3497, %v397_v30   ;;  %466 = vperm.xlu0 %3496, %v396_v31   ;;  %v868_v30 = vld [vmem:[%s3983_s14 + $0xf0] sm:$0xff]  ;;  %v869_v31 = vld [vmem:[%s3983_s14 + $0xf8] sm:$0xff]  ;;  %v3281_v29 = vpack.c.bf16 %v891_v22, %v890_v20  ;;  %v914_v10 = vld [vmem:[%s3983_s14 + $0x260] sm:$0xff] }
  0xb1   : > { %v3248_v35 = vpack.c.bf16 %v869_v31, %v868_v30  ;;  %v892_v31 = vld [vmem:[%s3983_s14 + $0x1b0] sm:$0xff]  ;;  %v917_v20 = vld [vmem:[%s3983_s14 + $0x278] sm:$0xff] }
  0xb4   : > { %481 = vperm.xlu1 %3497, %v399_v36   ;;  %476 = vperm.xlu0 %3496, %v398_v37   ;;  %v872_v36 = vld [vmem:[%s3983_s14 + $0x110] sm:$0xff]  ;;  %v873_v37 = vld [vmem:[%s3983_s14 + $0x118] sm:$0xff] }
  0xb8   : > { %491 = vperm.xlu1 %3497, %v401_v39   ;;  %486 = vperm.xlu0 %3496, %v400_v40   ;;  %v879_v39 = vld [vmem:[%s3983_s14 + $0x148] sm:$0xff] }
  0xbc   : > { %501 = vperm.xlu1 %3497, %v403_v41   ;;  %496 = vperm.xlu0 %3496, %v402_v42   ;;  %v2620_v41 = vld [vmem:[%s3969_s9 + $0x4] ss:$0 sm:$0xff] }
  0xc0   : > { %511 = vperm.xlu1 %3497, %v405_v43   ;;  %506 = vperm.xlu0 %3496, %v404_v44   ;;  %v3254_v43 = vpack.c.bf16 %v873_v37, %v872_v36  ;;  %v3263_v44 = vpack.c.bf16 %v879_v39, %v878_v38  ;;  %v899_v36 = vld [vmem:[%s3983_s14 + $0x1e8] sm:$0xff]  ;;  %v2641_v38 = vld [vmem:[%s3976_s27 + $0x7] ss:$0 sm:$0xff] }
 0x11f   : > { %v427_v47 = vpop.permute.xlu0 %426  ;;  %v437_v0 = vpop.permute.xlu1 %436 }
 0x120   : > { %v622_v48 = vmul.f32 %v2616_v45, %v427_v47  ;;  %v624_v4 = vmul.f32 %v2618_v57, %v437_v0  ;;  %v874_v45 = vld [vmem:[%s3983_s14 + $0x120] sm:$0xff]  ;;  %v3269_v0 = vpack.c.bf16 %v883_v60, %v882_v59  ;;  %v907_v60 = vld [vmem:[%s3983_s14 + $0x228] sm:$0xff] }
 0x121   : > { %v906_v59 = vld [vmem:[%s3983_s14 + $0x220] sm:$0xff] }
 0x122   : > { %v766_v51 = vadd.f32 %v2634_v46, %v622_v48  ;;  %v768_v13 = vadd.f32 %v2636_v3, %v624_v4  ;;  %v875_v46 = vld [vmem:[%s3983_s14 + $0x128] sm:$0xff]  ;;  %v880_v48 = vld [vmem:[%s3983_s14 + $0x150] sm:$0xff] }
 0x123   : > { %v432_v53 = vpop.permute.xlu0 %431  ;;  %v442_v19 = vpop.permute.xlu1 %441  ;;  %v887_v3 = vld [vmem:[%s3983_s14 + $0x188] sm:$0xff] }
 0x124   : > { %v802_v54 = vmul.f32 0.01, %v766_v51  ;;  %v623_v58 = vmul.f32 %v2617_v52, %v432_v53  ;;  %vm784_vm2 = vcmp.ge.f32.partialorder %v766_v51, 0.0  ;;  %v625_v23 = vmul.f32 %v2619_v14, %v442_v19  ;;  %v2621_v52 = vld [vmem:[%s3969_s9 + $0x5] ss:$0 sm:$0xff] }
 0x125   : > { %v804_v24 = vmul.f32 0.01, %v768_v13  ;;  %vm786_vm4 = vcmp.ge.f32.partialorder %v768_v13, 0.0  ;;  %v3257_v53 = vpack.c.bf16 %v875_v46, %v874_v45  ;;  %v895_v14 = vld [vmem:[%s3983_s14 + $0x1c8] sm:$0xff]  ;;  %v901_v45 = vld [vmem:[%s3983_s14 + $0x1f8] sm:$0xff] }
 0x126   : > { %v820_v61 = vsel %vm784_vm2, %v766_v51, %v802_v54  ;;  %v767_v2 = vadd.f32 %v2635_v55, %v623_v58  ;;  %v769_v32 = vadd.f32 %v2637_v25, %v625_v23  ;;  %v3266_v54 = vpack.c.bf16 %v881_v49, %v880_v48  ;;  %v876_v55 = vld [vmem:[%s3983_s14 + $0x130] sm:$0xff]  ;;  %v897_v25 = vld [vmem:[%s3983_s14 + $0x1d8] sm:$0xff] }
 0x127   : > { %2877 = vmatmul.mubr.msk.f32.vlgmr.msra.gmra.mrb[0].mxu0 %vm1108_vm1, %v820_v61  ;;  %v822_v33 = vsel %vm786_vm4, %v768_v13, %v804_v24  ;;  %v447_v42 = vpop.permute.xlu0 %446  ;;  %v452_v57 = vpop.permute.xlu1 %451  ;;  %v894_v13 = vld [vmem:[%s3983_s14 + $0x1c0] sm:$0xff]  ;;  %v896_v24 = vld [vmem:[%s3983_s14 + $0x1d0] sm:$0xff] }
 0x128   : > { %3228 = vmatpush3.bf16.msra.mxu0 %v3227_v56  ;;  %2914 = vmatprep.mubr.msk.f32.mxu0 %vm3704_vm0, %v3705_v21  ;;  %v803_v6 = vmul.f32 0.01, %v767_v2  ;;  %vm785_vm3 = vcmp.ge.f32.partialorder %v767_v2, 0.0  ;;  %v805_v40 = vmul.f32 0.01, %v769_v32  ;;  %vm787_vm5 = vcmp.ge.f32.partialorder %v769_v32, 0.0 }
 0x129   : > { %3229 = vmatprep.subr.bf16.mxu0 %v3703_v1  ;;  %v626_v47 = vmul.f32 %v2620_v41, %v447_v42  ;;  %v877_v56 = vld [vmem:[%s3983_s14 + $0x138] sm:$0xff]  ;;  %v627_v61 = vmul.f32 %v2621_v52, %v452_v57  ;;  %v3287_v19 = vpack.c.bf16 %v895_v14, %v894_v13  ;;  %v3290_v30 = vpack.c.bf16 %v897_v25, %v896_v24  ;;  %v902_v41 = vld [vmem:[%s3983_s14 + $0x200] sm:$0xff]  ;;  %v903_v42 = vld [vmem:[%s3983_s14 + $0x208] sm:$0xff] }
 0x12a   : > { %v821_v12 = vsel %vm785_vm3, %v767_v2, %v803_v6  ;;  %v823_v51 = vsel %vm787_vm5, %v769_v32, %v805_v40  ;;  %v3260_v63 = vpack.c.bf16 %v877_v56, %v876_v55  ;;  %v886_v2 = vld [vmem:[%s3983_s14 + $0x180] sm:$0xff]  ;;  %v885_v6 = vld [vmem:[%s3983_s14 + $0x178] sm:$0xff]  ;;  %v904_v49 = vld [vmem:[%s3983_s14 + $0x210] sm:$0xff] }
 0x12b   : > { %2896 = vmatmul.mubr.msk.f32.vlgmr.msra.gmra.mrb[0].mxu1 %vm1108_vm1, %v821_v12  ;;  %v770_v58 = vadd.f32 %v2638_v50, %v626_v47  ;;  %v3275_v8 = vpack.c.bf16 %v887_v3, %v886_v2  ;;  %v457_v17 = vpop.permute.xlu0 %456  ;;  %v893_v32 = vld [vmem:[%s3983_s14 + $0x1b8] sm:$0xff]  ;;  %v3299_v47 = vpack.c.bf16 %v903_v42, %v902_v41  ;;  %v910_v52 = vld [vmem:[%s3983_s14 + $0x240] sm:$0xff]  ;;  %v920_v25 = vld [vmem:[%s3983_s14 + $0x290] sm:$0xff] }
 0x12c   : > { %3231 = vmatpush3.bf16.msra.mxu0 %v3230_v5  ;;  %3240 = vmatpush3.bf16.msra.mxu1 %v3239_v7  ;;  %v884_v5 = vld [vmem:[%s3983_s14 + $0x170] sm:$0xff]  ;;  %v771_v7 = vadd.f32 %v2639_v62, %v627_v61  ;;  %v3284_v39 = vpack.c.bf16 %v893_v32, %v892_v31  ;;  %v905_v50 = vld [vmem:[%s3983_s14 + $0x218] sm:$0xff] }
 0x12d   : > { %3232 = vmatprep.subr.bf16.mxu0 %v3703_v1  ;;  %3241 = vmatprep.subr.bf16.mxu1 %v3703_v1  ;;  %v806_v4 = vmul.f32 0.01, %v770_v58  ;;  %vm788_vm6 = vcmp.ge.f32.partialorder %v770_v58, 0.0  ;;  %v3272_v9 = vpack.c.bf16 %v885_v6, %v884_v5  ;;  %v2624_v55 = vld [vmem:[%s3969_s9 + $0x8] ss:$0 sm:$0xff]  ;;  %v3302_v57 = vpack.c.bf16 %v905_v50, %v904_v49  ;;  %v931_v50 = vld [vmem:[%s3983_s14 + $0x2e8] sm:$0xff] }
 0x12e   : > { %2933 = vmatprep.mubr.msk.f32.mxu1 %vm3704_vm0, %v3705_v21  ;;  %vm789_vm7 = vcmp.ge.f32.partialorder %v771_v7, 0.0  ;;  %v912_v62 = vld [vmem:[%s3983_s14 + $0x250] sm:$0xff]  ;;  %v3305_v5 = vpack.c.bf16 %v907_v60, %v906_v59  ;;  %v930_v49 = vld [vmem:[%s3983_s14 + $0x2e0] sm:$0xff]  ;;  %v933_v59 = vld [vmem:[%s3983_s14 + $0x2f8] sm:$0xff] }
 0x12f   : > { %v824_v12 = vsel %vm788_vm6, %v770_v58, %v806_v4  ;;  %v467_v56 = vpop.permute.xlu0 %466  ;;  %v2625_v3 = vld [vmem:[%s3969_s9 + $0x9] ss:$0 sm:$0xff]  ;;  %v2643_v13 = vld [vmem:[%s3976_s27 + $0x9] ss:$0 sm:$0xff]  ;;  %v2626_v31 = vld [vmem:[%s3969_s9 + $0xa] ss:$0 sm:$0xff] }
 0x130   : > { %3234 = vmatpush3.bf16.msra.mxu0 %v3233_v15  ;;  %3243 = vmatpush3.bf16.msra.mxu1 %v3242_v16  ;;  %v807_v15 = vmul.f32 0.01, %v771_v7  ;;  %v2622_v16 = vld [vmem:[%s3969_s9 + $0x6] ss:$0 sm:$0xff]  ;;  %v630_v61 = vmul.f32 %v2624_v55, %v467_v56  ;;  %v2627_v42 = vld [vmem:[%s3969_s9 + $0xb] ss:$0 sm:$0xff] }
 0x131   : > { %3235 = vmatprep.subr.bf16.mxu0 %v3703_v1  ;;  %3244 = vmatprep.subr.bf16.mxu1 %v3703_v1  ;;  %v628_v23 = vmul.f32 %v2622_v16, %v457_v17  ;;  %v918_v16 = vld [vmem:[%s3983_s14 + $0x280] sm:$0xff]  ;;  %v919_v17 = vld [vmem:[%s3983_s14 + $0x288] sm:$0xff] }
 0x132   : > { %v934_v55 = vld [vmem:[%s3983_s14 + $0x300] sm:$0xff]  ;;  %v935_v56 = vld [vmem:[%s3983_s14 + $0x308] sm:$0xff] }
 0x133   : > { %v477_v32 = vpop.permute.xlu0 %476 }
 0x134   : > { %3237 = vmatpush3.bf16.msra.mxu0 %v3236_v26  ;;  %3246 = vmatpush3.bf16.msra.mxu1 %v3245_v27  ;;  %v2640_v26 = vld [vmem:[%s3976_s27 + $0x6] ss:$0 sm:$0xff]  ;;  %v825_v27 = vsel %vm789_vm7, %v771_v7, %v807_v15  ;;  %v3317_v15 = vpack.c.bf16 %v915_v11, %v914_v10  ;;  %v939_v11 = vld [vmem:[%s3983_s14 + $0x328] sm:$0xff] }
 0x135   : > { %3250 = vmatprep.subr.bf16.mxu0 %v3703_v1  ;;  %3247 = vmatprep.subr.bf16.mxu1 %v3703_v1  ;;  %v908_v7 = vld [vmem:[%s3983_s14 + $0x230] sm:$0xff]  ;;  %v938_v10 = vld [vmem:[%s3983_s14 + $0x320] sm:$0xff] }
 0x137   : > { %2915 = vmatmul.mubr.msk.f32.vlgmr.msra.gmra.mrb[2].mxu0 %vm1108_vm1, %v822_v33  ;;  %v462_v33 = vpop.permute.xlu1 %461 }
 0x138   : > { %3252 = vmatpush3.bf16.msra.mxu0 %v3251_v34  ;;  %2952 = vmatprep.mubr.msk.f32.mxu0 %vm3704_vm0, %v3705_v21  ;;  %v772_v34 = vadd.f32 %v2640_v26, %v628_v23  ;;  %v629_v37 = vmul.f32 %v2623_v28, %v462_v33  ;;  %v3323_v23 = vpack.c.bf16 %v919_v17, %v918_v16  ;;  %v921_v26 = vld [vmem:[%s3983_s14 + $0x298] sm:$0xff]  ;;  %v926_v28 = vld [vmem:[%s3983_s14 + $0x2c0] sm:$0xff] }
 0x139   : > { %3249 = vmatpush3.bf16.msra.mxu1 %v3248_v35  ;;  %3253 = vmatprep.subr.bf16.mxu0 %v3703_v1  ;;  %v898_v35 = vld [vmem:[%s3983_s14 + $0x1e0] sm:$0xff]  ;;  %v3326_v33 = vpack.c.bf16 %v921_v26, %v920_v25  ;;  %v947_v26 = vld [vmem:[%s3983_s14 + $0x368] sm:$0xff] }
 0x13a   : > { %3262 = vmatprep.subr.bf16.mxu1 %v3703_v1  ;;  %v3293_v40 = vpack.c.bf16 %v899_v36, %v898_v35  ;;  %v773_v46 = vadd.f32 %v2641_v38, %v629_v37  ;;  %vm790_vm8 = vcmp.ge.f32.partialorder %v772_v34, 0.0  ;;  %v922_v35 = vld [vmem:[%s3983_s14 + $0x2a0] sm:$0xff]  ;;  %v923_v36 = vld [vmem:[%s3983_s14 + $0x2a8] sm:$0xff]  ;;  %v632_v37 = vmul.f32 %v2626_v31, %v477_v32  ;;  %v928_v38 = vld [vmem:[%s3983_s14 + $0x2d0] sm:$0xff] }
 0x13b   : > { %v472_v4 = vpop.permute.xlu1 %471  ;;  %v2629_v17 = vld [vmem:[%s3969_s9 + $0xd] ss:$0 sm:$0xff]  ;;  %v951_v32 = vld [vmem:[%s3983_s14 + $0x388] sm:$0xff] }
 0x13c   : > { %2934 = vmatmul.mubr.msk.f32.vlgmr.msra.gmra.mrb[2].mxu1 %vm1108_vm1, %v823_v51  ;;  %3255 = vmatpush3.bf16.msra.mxu0 %v3254_v43  ;;  %v808_v43 = vmul.f32 0.01, %v772_v34  ;;  %vm791_vm9 = vcmp.ge.f32.partialorder %v773_v46, 0.0  ;;  %v946_v25 = vld [vmem:[%s3983_s14 + $0x360] sm:$0xff] }
 0x13d   : > { %3264 = vmatpush3.bf16.msra.mxu1 %v3263_v44  ;;  %3256 = vmatprep.subr.bf16.mxu0 %v3703_v1  ;;  %v900_v44 = vld [vmem:[%s3983_s14 + $0x1f0] sm:$0xff]  ;;  %v950_v31 = vld [vmem:[%s3983_s14 + $0x380] sm:$0xff] }
 0x13e   : > { %3265 = vmatprep.subr.bf16.mxu1 %v3703_v1  ;;  %2971 = vmatprep.mubr.msk.f32.mxu1 %vm3704_vm0, %v3705_v21  ;;  %v3296_v48 = vpack.c.bf16 %v901_v45, %v900_v44  ;;  %v826_v51 = vsel %vm790_vm8, %v772_v34, %v808_v43  ;;  %v3329_v44 = vpack.c.bf16 %v923_v36, %v922_v35  ;;  %v949_v35 = vld [vmem:[%s3983_s14 + $0x378] sm:$0xff] }
 0x13f   : > { %v482_v43 = vpop.permute.xlu1 %481 }
 0x140   : > { %3258 = vmatpush3.bf16.msra.mxu0 %v3257_v53  ;;  %v911_v53 = vld [vmem:[%s3983_s14 + $0x248] sm:$0xff] }
 0x141   : > { %3267 = vmatpush3.bf16.msra.mxu1 %v3266_v54  ;;  %3259 = vmatprep.subr.bf16.mxu0 %v3703_v1  ;;  %v809_v54 = vmul.f32 0.01, %v773_v46  ;;  %v3311_v58 = vpack.c.bf16 %v911_v53, %v910_v52  ;;  %v2645_v52 = vld [vmem:[%s3976_s27 + $0xb] ss:$0 sm:$0xff] }
 0x142   : > { %3268 = vmatprep.subr.bf16.mxu1 %v3703_v1 }
 0x143   : > { %v827_v2 = vsel %vm791_vm9, %v773_v46, %v809_v54  ;;  %v924_v46 = vld [vmem:[%s3983_s14 + $0x2b0] sm:$0xff]  ;;  %v3341_v54 = vpack.c.bf16 %v931_v50, %v930_v49  ;;  %v954_v49 = vld [vmem:[%s3983_s14 + $0x3a0] sm:$0xff]  ;;  %v955_v50 = vld [vmem:[%s3983_s14 + $0x3a8] sm:$0xff] }
 0x144   : > { %3261 = vmatpush3.bf16.msra.mxu0 %v3260_v63  ;;  %v913_v63 = vld [vmem:[%s3983_s14 + $0x258] sm:$0xff] }
 0x145   : > { %3270 = vmatpush3.bf16.msra.mxu1 %v3269_v0  ;;  %3274 = vmatprep.subr.bf16.mxu0 %v3703_v1  ;;  %v2642_v0 = vld [vmem:[%s3976_s27 + $0x8] ss:$0 sm:$0xff]  ;;  %v3314_v6 = vpack.c.bf16 %v913_v63, %v912_v62 }
 0x146   : > { %3271 = vmatprep.subr.bf16.mxu1 %v3703_v1  ;;  %v936_v63 = vld [vmem:[%s3983_s14 + $0x310] sm:$0xff] }
 0x147   : > { %2953 = vmatmul.mubr.msk.f32.vlgmr.msra.gmra.mrb[4].mxu0 %vm1108_vm1, %v824_v12  ;;  %v631_v12 = vmul.f32 %v2625_v3, %v472_v4  ;;  %v942_v3 = vld [vmem:[%s3983_s14 + $0x340] sm:$0xff]  ;;  %v943_v4 = vld [vmem:[%s3983_s14 + $0x348] sm:$0xff] }
 0x148   : > { %3276 = vmatpush3.bf16.msra.mxu0 %v3275_v8  ;;  %2990 = vmatprep.mubr.msk.f32.mxu0 %vm3704_vm0, %v3705_v21  ;;  %v909_v8 = vld [vmem:[%s3983_s14 + $0x238] sm:$0xff] }
 0x149   : > { %3273 = vmatpush3.bf16.msra.mxu1 %v3272_v9  ;;  %3277 = vmatprep.subr.bf16.mxu0 %v3703_v1  ;;  %v774_v9 = vadd.f32 %v2642_v0, %v630_v61  ;;  %v3308_v14 = vpack.c.bf16 %v909_v8, %v908_v7  ;;  %v775_v22 = vadd.f32 %v2643_v13, %v631_v12  ;;  %v937_v0 = vld [vmem:[%s3983_s14 + $0x318] sm:$0xff]  ;;  %v487_v7 = vpop.permute.xlu0 %486  ;;  %v944_v13 = vld [vmem:[%s3983_s14 + $0x350] sm:$0xff] }
 0x14a   : > { %3286 = vmatprep.subr.bf16.mxu1 %v3703_v1  ;;  %v3347_v61 = vpack.c.bf16 %v935_v56, %v934_v55  ;;  %v3350_v8 = vpack.c.bf16 %v937_v0, %v936_v63  ;;  %v2631_v56 = vld [vmem:[%s3969_s9 + $0xf] ss:$0 sm:$0xff]  ;;  %v963_v0 = vld [vmem:[%s3983_s14 + $0x3e8] sm:$0xff] }
 0x14b   : > { %vm792_vm10 = vcmp.ge.f32.partialorder %v774_v9, 0.0  ;;  %vm793_vm11 = vcmp.ge.f32.partialorder %v775_v22, 0.0  ;;  %v962_v63 = vld [vmem:[%s3983_s14 + $0x3e0] sm:$0xff] }
 0x14c   : > { %2972 = vmatmul.mubr.msk.f32.vlgmr.msra.gmra.mrb[4].mxu1 %vm1108_vm1, %v825_v27  ;;  %3279 = vmatpush3.bf16.msra.mxu0 %v3278_v18  ;;  %v810_v18 = vmul.f32 0.01, %v774_v9 }
 0x14d   : > { %3288 = vmatpush3.bf16.msra.mxu1 %v3287_v19  ;;  %3280 = vmatprep.subr.bf16.mxu0 %v3703_v1  ;;  %v916_v19 = vld [vmem:[%s3983_s14 + $0x270] sm:$0xff] }
 0x14e   : > { %3289 = vmatprep.subr.bf16.mxu1 %v3703_v1  ;;  %3009 = vmatprep.mubr.msk.f32.mxu1 %vm3704_vm0, %v3705_v21  ;;  %v3320_v24 = vpack.c.bf16 %v917_v20, %v916_v19  ;;  %v828_v27 = vsel %vm792_vm10, %v774_v9, %v810_v18  ;;  %v3359_v9 = vpack.c.bf16 %v943_v4, %v942_v3  ;;  %v492_v18 = vpop.permute.xlu1 %491  ;;  %v2649_v3 = vld [vmem:[%s3976_s27 + $0xf] ss:$0 sm:$0xff] }
 0x14f   : > { %v3353_v19 = vpack.c.bf16 %v939_v11, %v938_v10  ;;  %v965_v10 = vld [vmem:[%s3983_s14 + $0x3f8] sm:$0xff] }
 0x150   : > { %3282 = vmatpush3.bf16.msra.mxu0 %v3281_v29  ;;  %v927_v29 = vld [vmem:[%s3983_s14 + $0x2c8] sm:$0xff] }
 0x151   : > { %3291 = vmatpush3.bf16.msra.mxu1 %v3290_v30  ;;  %3283 = vmatprep.subr.bf16.mxu0 %v3703_v1  ;;  %v811_v30 = vmul.f32 0.01, %v775_v22  ;;  %v3335_v34 = vpack.c.bf16 %v927_v29, %v926_v28  ;;  %v2647_v28 = vld [vmem:[%s3976_s27 + $0xd] ss:$0 sm:$0xff] }
 0x152   : > { %3292 = vmatprep.subr.bf16.mxu1 %v3703_v1 }
 0x153   : > { %v829_v41 = vsel %vm793_vm11, %v775_v22, %v811_v30  ;;  %v940_v22 = vld [vmem:[%s3983_s14 + $0x330] sm:$0xff]  ;;  %v3365_v30 = vpack.c.bf16 %v947_v26, %v946_v25  ;;  %v970_v25 = vld [vmem:[%s3983_s14 + $0x420] sm:$0xff]  ;;  %v971_v26 = vld [vmem:[%s3983_s14 + $0x428] sm:$0xff] }
 0x154   : > { %3285 = vmatpush3.bf16.msra.mxu0 %v3284_v39  ;;  %v929_v39 = vld [vmem:[%s3983_s14 + $0x2d8] sm:$0xff] }
 0x155   : > { %3294 = vmatpush3.bf16.msra.mxu1 %v3293_v40  ;;  %3298 = vmatprep.subr.bf16.mxu0 %v3703_v1  ;;  %v2644_v40 = vld [vmem:[%s3976_s27 + $0xa] ss:$0 sm:$0xff]  ;;  %v3338_v45 = vpack.c.bf16 %v929_v39, %v928_v38  ;;  %v952_v39 = vld [vmem:[%s3983_s14 + $0x390] sm:$0xff] }
 0x156   : > { %3295 = vmatprep.subr.bf16.mxu1 %v3703_v1 }
 0x157   : > { %2991 = vmatmul.mubr.msk.f32.vlgmr.msra.gmra.mrb[6].mxu0 %vm1108_vm1, %v826_v51  ;;  %v633_v51 = vmul.f32 %v2627_v42, %v482_v43  ;;  %v958_v42 = vld [vmem:[%s3983_s14 + $0x3c0] sm:$0xff]  ;;  %v959_v43 = vld [vmem:[%s3983_s14 + $0x3c8] sm:$0xff] }
 0x158   : > { %3300 = vmatpush3.bf16.msra.mxu0 %v3299_v47  ;;  %3028 = vmatprep.mubr.msk.f32.mxu0 %vm3704_vm0, %v3705_v21  ;;  %v925_v47 = vld [vmem:[%s3983_s14 + $0x2b8] sm:$0xff] }
 0x159   : > { %3297 = vmatpush3.bf16.msra.mxu1 %v3296_v48  ;;  %3301 = vmatprep.subr.bf16.mxu0 %v3703_v1  ;;  %v776_v48 = vadd.f32 %v2644_v40, %v632_v37  ;;  %v3332_v53 = vpack.c.bf16 %v925_v47, %v924_v46  ;;  %v777_v60 = vadd.f32 %v2645_v52, %v633_v51  ;;  %v953_v40 = vld [vmem:[%s3983_s14 + $0x398] sm:$0xff]  ;;  %v497_v46 = vpop.permute.xlu0 %496  ;;  %v960_v52 = vld [vmem:[%s3983_s14 + $0x3d0] sm:$0xff] }
 0x15a   : > { %3310 = vmatprep.subr.bf16.mxu1 %v3703_v1  ;;  %v3371_v37 = vpack.c.bf16 %v951_v32, %v950_v31  ;;  %v3374_v47 = vpack.c.bf16 %v953_v40, %v952_v39  ;;  %v2633_v32 = vld [vmem:[%s3969_s9 + $0x11] ss:$0 sm:$0xff]  ;;  %v978_v39 = vld [vmem:[%s3983_s14 + $0x460] sm:$0xff] }
 0x15b   : > { %vm794_vm12 = vcmp.ge.f32.partialorder %v776_v48, 0.0  ;;  %vm795_vm13 = vcmp.ge.f32.partialorder %v777_v60, 0.0  ;;  %v979_v40 = vld [vmem:[%s3983_s14 + $0x468] sm:$0xff] }
 0x15c   : > { %3010 = vmatmul.mubr.msk.f32.vlgmr.msra.gmra.mrb[6].mxu1 %vm1108_vm1, %v827_v2  ;;  %3303 = vmatpush3.bf16.msra.mxu0 %v3302_v57  ;;  %v812_v57 = vmul.f32 0.01, %v776_v48 }
 0x15d   : > { %3312 = vmatpush3.bf16.msra.mxu1 %v3311_v58  ;;  %3304 = vmatprep.subr.bf16.mxu0 %v3703_v1  ;;  %v932_v58 = vld [vmem:[%s3983_s14 + $0x2f0] sm:$0xff] }
 0x15e   : > { %3313 = vmatprep.subr.bf16.mxu1 %v3703_v1  ;;  %3047 = vmatprep.mubr.msk.f32.mxu1 %vm3704_vm0, %v3705_v21  ;;  %v3344_v62 = vpack.c.bf16 %v933_v59, %v932_v58  ;;  %v830_v2 = vsel %vm794_vm12, %v776_v48, %v812_v57  ;;  %v3383_v48 = vpack.c.bf16 %v959_v43, %v958_v42  ;;  %v502_v57 = vpop.permute.xlu1 %501  ;;  %v2651_v42 = vld [vmem:[%s3976_s27 + $0x11] ss:$0 sm:$0xff] }
 0x15f   : > { %v3377_v58 = vpack.c.bf16 %v955_v50, %v954_v49 }
 0x160   : > { %3306 = vmatpush3.bf16.msra.mxu0 %v3305_v5  ;;  %v813_v5 = vmul.f32 0.01, %v777_v60 }
 0x161   : > { %3315 = vmatpush3.bf16.msra.mxu1 %v3314_v6  ;;  %3307 = vmatprep.subr.bf16.mxu0 %v3703_v1  ;;  %v2628_v6 = vld [vmem:[%s3969_s9 + $0xc] ss:$0 sm:$0xff] }
 0x162   : > { %3316 = vmatprep.subr.bf16.mxu1 %v3703_v1  ;;  %v634_v12 = vmul.f32 %v2628_v6, %v487_v7  ;;  %v831_v16 = vsel %vm795_vm13, %v777_v60, %v813_v5  ;;  %v956_v60 = vld [vmem:[%s3983_s14 + $0x3b0] sm:$0xff]  ;;  %v3389_v5 = vpack.c.bf16 %v963_v0, %v962_v63  ;;  %v966_v6 = vld [vmem:[%s3983_s14 + $0x400] sm:$0xff]  ;;  %v967_v7 = vld [vmem:[%s3983_s14 + $0x408] sm:$0xff] }
 0x163   : > { %v2655_v63 = vld [vmem:[%s3986_s20 + $0x3] ss:$0 sm:$0xff] }
 0x164   : > { %3309 = vmatpush3.bf16.msra.mxu0 %v3308_v14  ;;  %v945_v14 = vld [vmem:[%s3983_s14 + $0x358] sm:$0xff] }
 0x165   : > { %3318 = vmatpush3.bf16.msra.mxu1 %v3317_v15  ;;  %3322 = vmatprep.subr.bf16.mxu0 %v3703_v1  ;;  %v2646_v15 = vld [vmem:[%s3976_s27 + $0xc] ss:$0 sm:$0xff]  ;;  %v3362_v20 = vpack.c.bf16 %v945_v14, %v944_v13  ;;  %v968_v14 = vld [vmem:[%s3983_s14 + $0x410] sm:$0xff] }
 0x166   : > { %3319 = vmatprep.subr.bf16.mxu1 %v3703_v1 }
 0x167   : > { %3029 = vmatmul.mubr.msk.f32.vlgmr.msra.gmra.mrb[8].mxu0 %vm1108_vm1, %v828_v27  ;;  %v635_v27 = vmul.f32 %v2629_v17, %v492_v18  ;;  %v974_v17 = vld [vmem:[%s3983_s14 + $0x440] sm:$0xff]  ;;  %v975_v18 = vld [vmem:[%s3983_s14 + $0x448] sm:$0xff] }
 0x168   : > { %3324 = vmatpush3.bf16.msra.mxu0 %v3323_v23  ;;  %3066 = vmatprep.mubr.msk.f32.mxu0 %vm3704_vm0, %v3705_v21  ;;  %v941_v23 = vld [vmem:[%s3983_s14 + $0x338] sm:$0xff] }
 0x169   : > { %3321 = vmatpush3.bf16.msra.mxu1 %v3320_v24  ;;  %3325 = vmatprep.subr.bf16.mxu0 %v3703_v1  ;;  %v778_v24 = vadd.f32 %v2646_v15, %v634_v12  ;;  %v3356_v29 = vpack.c.bf16 %v941_v23, %v940_v22  ;;  %v779_v36 = vadd.f32 %v2647_v28, %v635_v27  ;;  %v969_v15 = vld [vmem:[%s3983_s14 + $0x418] sm:$0xff]  ;;  %v507_v22 = vpop.permute.xlu0 %506  ;;  %v976_v28 = vld [vmem:[%s3983_s14 + $0x450] sm:$0xff] }
 0x16a   : > { %3334 = vmatprep.subr.bf16.mxu1 %v3703_v1  ;;  %v3395_v12 = vpack.c.bf16 %v967_v7, %v966_v6  ;;  %v3398_v23 = vpack.c.bf16 %v969_v15, %v968_v14 }
 0x16b   : > { %vm796_vm14 = vcmp.ge.f32.partialorder %v778_v24, 0.0  ;;  %vm797_vm15 = vcmp.ge.f32.partialorder %v779_v36, 0.0 }
 0x16c   : > { %3048 = vmatmul.mubr.msk.f32.vlgmr.msra.gmra.mrb[8].mxu1 %vm1108_vm1, %v829_v41  ;;  %3327 = vmatpush3.bf16.msra.mxu0 %v3326_v33  ;;  %v814_v33 = vmul.f32 0.01, %v778_v24 }
 0x16d   : > { %3336 = vmatpush3.bf16.msra.mxu1 %v3335_v34  ;;  %3328 = vmatprep.subr.bf16.mxu0 %v3703_v1  ;;  %v948_v34 = vld [vmem:[%s3983_s14 + $0x370] sm:$0xff] }
 0x16e   : > { %3337 = vmatprep.subr.bf16.mxu1 %v3703_v1  ;;  %3085 = vmatprep.mubr.msk.f32.mxu1 %vm3704_vm0, %v3705_v21  ;;  %v3368_v38 = vpack.c.bf16 %v949_v35, %v948_v34  ;;  %v832_v41 = vsel %vm796_vm14, %v778_v24, %v814_v33  ;;  %v3407_v24 = vpack.c.bf16 %v975_v18, %v974_v17  ;;  %v512_v33 = vpop.permute.xlu1 %511 }
 0x16f   : > { %v3401_v34 = vpack.c.bf16 %v971_v26, %v970_v25  ;;  %v2661_v25 = vld [vmem:[%s3986_s20 + $0x9] ss:$0 sm:$0xff] }
 0x170   : > { %3330 = vmatpush3.bf16.msra.mxu0 %v3329_v44  ;;  %v815_v44 = vmul.f32 0.01, %v779_v36 }
 0x171   : > { %3339 = vmatpush3.bf16.msra.mxu1 %v3338_v45  ;;  %3331 = vmatprep.subr.bf16.mxu0 %v3703_v1  ;;  %v2630_v45 = vld [vmem:[%s3969_s9 + $0xe] ss:$0 sm:$0xff] }
 0x172   : > { %3340 = vmatprep.subr.bf16.mxu1 %v3703_v1  ;;  %v636_v51 = vmul.f32 %v2630_v45, %v497_v46  ;;  %v833_v55 = vsel %vm797_vm15, %v779_v36, %v815_v44  ;;  %v972_v36 = vld [vmem:[%s3983_s14 + $0x430] sm:$0xff]  ;;  %v3413_v44 = vpack.c.bf16 %v979_v40, %v978_v39 }
 0x173   : > { %v980_v46 = vld [vmem:[%s3983_s14 + $0x470] sm:$0xff] }
 0x174   : > { %3333 = vmatpush3.bf16.msra.mxu0 %v3332_v53  ;;  %v961_v53 = vld [vmem:[%s3983_s14 + $0x3d8] sm:$0xff] }
 0x175   : > { %3342 = vmatpush3.bf16.msra.mxu1 %v3341_v54  ;;  %3346 = vmatprep.subr.bf16.mxu0 %v3703_v1  ;;  %v2648_v54 = vld [vmem:[%s3976_s27 + $0xe] ss:$0 sm:$0xff]  ;;  %v3386_v59 = vpack.c.bf16 %v961_v53, %v960_v52  ;;  %v2652_v52 = vld [vmem:[%s3986_s20] ss:$0 sm:$0xff] }
 0x176   : > { %3343 = vmatprep.subr.bf16.mxu1 %v3703_v1 }
 0x177   : > { %3067 = vmatmul.mubr.msk.f32.vlgmr.msra.gmra.mrb[10].mxu0 %vm1108_vm1, %v830_v2  ;;  %v637_v2 = vmul.f32 %v2631_v56, %v502_v57 }
 0x178   : > { %3348 = vmatpush3.bf16.msra.mxu0 %v3347_v61  ;;  %3104 = vmatprep.mubr.msk.f32.mxu0 %vm3704_vm0, %v3705_v21  ;;  %v957_v61 = vld [vmem:[%s3983_s14 + $0x3b8] sm:$0xff] }
 0x179   : > { %3345 = vmatpush3.bf16.msra.mxu1 %v3344_v62  ;;  %3349 = vmatprep.subr.bf16.mxu0 %v3703_v1  ;;  %v780_v62 = vadd.f32 %v2648_v54, %v636_v51  ;;  %v3380_v4 = vpack.c.bf16 %v957_v61, %v956_v60  ;;  %v781_v11 = vadd.f32 %v2649_v3, %v637_v2 }
 0x17a   : > { %3358 = vmatprep.subr.bf16.mxu1 %v3703_v1 }
 0x17b   : > { %vm798_vm2 = vcmp.ge.f32.partialorder %v780_v62, 0.0  ;;  %vm799_vm3 = vcmp.ge.f32.partialorder %v781_v11, 0.0 }
 0x17c   : > { %3086 = vmatmul.mubr.msk.f32.vlgmr.msra.gmra.mrb[10].mxu1 %vm1108_vm1, %v831_v16  ;;  %3351 = vmatpush3.bf16.msra.mxu0 %v3350_v8  ;;  %v816_v8 = vmul.f32 0.01, %v780_v62 }
 0x17d   : > { %3360 = vmatpush3.bf16.msra.mxu1 %v3359_v9  ;;  %3352 = vmatprep.subr.bf16.mxu0 %v3703_v1  ;;  %v964_v9 = vld [vmem:[%s3983_s14 + $0x3f0] sm:$0xff] }
 0x17e   : > { %3361 = vmatprep.subr.bf16.mxu1 %v3703_v1  ;;  %3123 = vmatprep.mubr.msk.f32.mxu1 %vm3704_vm0, %v3705_v21  ;;  %v3392_v13 = vpack.c.bf16 %v965_v10, %v964_v9  ;;  %v834_v16 = vsel %vm798_vm2, %v780_v62, %v816_v8  ;;  %v2657_v8 = vld [vmem:[%s3986_s20 + $0x5] ss:$0 sm:$0xff] }
 0x180   : > { %3354 = vmatpush3.bf16.msra.mxu0 %v3353_v19  ;;  %v817_v19 = vmul.f32 0.01, %v781_v11 }
 0x181   : > { %3363 = vmatpush3.bf16.msra.mxu1 %v3362_v20  ;;  %3355 = vmatprep.subr.bf16.mxu0 %v3703_v1  ;;  %v2632_v20 = vld [vmem:[%s3969_s9 + $0x10] ss:$0 sm:$0xff]  ;;  %s2442_s9 = scalar_lea.sflag [#allocation4], %s3965_s23 }
 0x182   : > { %3364 = vmatprep.subr.bf16.mxu1 %v3703_v1  ;;  %v638_v27 = vmul.f32 %v2632_v20, %v507_v22  ;;  %v835_v31 = vsel %vm799_vm3, %v781_v11, %v817_v19  ;;  %v2660_v20 = vld [vmem:[%s3986_s20 + $0x8] ss:$0 sm:$0xff] }
 0x184   : > { %3357 = vmatpush3.bf16.msra.mxu0 %v3356_v29  ;;  %v977_v29 = vld [vmem:[%s3983_s14 + $0x458] sm:$0xff] }
 0x185   : > { %3366 = vmatpush3.bf16.msra.mxu1 %v3365_v30  ;;  %3370 = vmatprep.subr.bf16.mxu0 %v3703_v1  ;;  %v2650_v30 = vld [vmem:[%s3976_s27 + $0x10] ss:$0 sm:$0xff]  ;;  %v3410_v35 = vpack.c.bf16 %v977_v29, %v976_v28  ;;  %v2662_v29 = vld [vmem:[%s3986_s20 + $0xa] ss:$0 sm:$0xff]  ;;  %s3624_s27 = scalar_lea.vmem %s3623_s26, 1152 }
 0x186   : > { %3367 = vmatprep.subr.bf16.mxu1 %v3703_v1  ;;  %p3626_p3 = scmp.lt.s32.totalorder %s3624_s27, %s3618_s6 }
 0x187   : > { %3105 = vmatmul.mubr.msk.f32.vlgmr.msra.gmra.mrb[12].mxu0 %vm1108_vm1, %v832_v41  ;;  %v639_v41 = vmul.f32 %v2633_v32, %v512_v33  ;;  %v2663_v33 = vld [vmem:[%s3986_s20 + $0xb] ss:$0 sm:$0xff] }
 0x188   : > { %3372 = vmatpush3.bf16.msra.mxu0 %v3371_v37  ;;  %3142 = vmatprep.mubr.msk.f32.mxu0 %vm3704_vm0, %v3705_v21  ;;  %v973_v37 = vld [vmem:[%s3983_s14 + $0x438] sm:$0xff]  ;;  %p3627_p5 = por %p3626_p3, %p3625_p4 }
 0x189   : > { %3369 = vmatpush3.bf16.msra.mxu1 %v3368_v38  ;;  %3373 = vmatprep.subr.bf16.mxu0 %v3703_v1  ;;  %v782_v38 = vadd.f32 %v2650_v30, %v638_v27  ;;  %v3404_v43 = vpack.c.bf16 %v973_v37, %v972_v36  ;;  %v2664_v37 = vld [vmem:[%s3986_s20 + $0xc] ss:$0 sm:$0xff] }
 0x18a   : > { %3382 = vmatprep.subr.bf16.mxu1 %v3703_v1  ;;  %p3628_p1 = pnand %p3627_p5, %p3621_p11 }
 0x18b   : > { %v818_v45 = vmul.f32 0.01, %v782_v38  ;;  %vm800_vm4 = vcmp.ge.f32.partialorder %v782_v38, 0.0 }
 0x18c   : > { %3124 = vmatmul.mubr.msk.f32.vlgmr.msra.gmra.mrb[12].mxu1 %vm1108_vm1, %v833_v55  ;;  %3375 = vmatpush3.bf16.msra.mxu0 %v3374_v47  ;;  %v981_v47 = vld [vmem:[%s3983_s14 + $0x478] sm:$0xff] }
 0x18d   : > { %3384 = vmatpush3.bf16.msra.mxu1 %v3383_v48  ;;  %3376 = vmatprep.subr.bf16.mxu0 %v3703_v1  ;;  %v783_v48 = vadd.f32 %v2651_v42, %v639_v41  ;;  %v836_v49 = vsel %vm800_vm4, %v782_v38, %v818_v45  ;;  %v2665_v41 = vld [vmem:[%s3986_s20 + $0xd] ss:$0 sm:$0xff]  ;;  %v2666_v45 = vld [vmem:[%s3986_s20 + $0xe] ss:$0 sm:$0xff] }
 0x18e   : > { %3385 = vmatprep.subr.bf16.mxu1 %v3703_v1  ;;  %3161 = vmatprep.mubr.msk.f32.mxu1 %vm3704_vm0, %v3705_v21 }
 0x18f   : > { %v819_v50 = vmul.f32 0.01, %v783_v48 }
 0x190   : > { %3378 = vmatpush3.bf16.msra.mxu0 %v3377_v58 }
 0x191   : > { %3387 = vmatpush3.bf16.msra.mxu1 %v3386_v59  ;;  %3379 = vmatprep.subr.bf16.mxu0 %v3703_v1  ;;  %v2654_v59 = vld [vmem:[%s3986_s20 + $0x2] ss:$0 sm:$0xff] }
 0x192   : > { %3388 = vmatprep.subr.bf16.mxu1 %v3703_v1 }
 0x194   : > { %3381 = vmatpush3.bf16.msra.mxu0 %v3380_v4  ;;  %v2656_v4 = vld [vmem:[%s3986_s20 + $0x4] ss:$0 sm:$0xff] }
 0x195   : > { %3390 = vmatpush3.bf16.msra.mxu1 %v3389_v5  ;;  %3394 = vmatprep.subr.bf16.mxu0 %v3703_v1 }
 0x196   : > { %3391 = vmatprep.subr.bf16.mxu1 %v3703_v1 }
 0x197   : > { %3143 = vmatmul.mubr.msk.f32.vlgmr.msra.gmra.mrb[14].mxu0 %vm1108_vm1, %v834_v16  ;;  %v2659_v16 = vld [vmem:[%s3986_s20 + $0x7] ss:$0 sm:$0xff] }
 0x198   : > { %3396 = vmatpush3.bf16.msra.mxu0 %v3395_v12  ;;  %3180 = vmatprep.mubr.msk.f32.mxu0 %vm3704_vm0, %v3705_v21  ;;  %v2658_v12 = vld [vmem:[%s3986_s20 + $0x6] ss:$0 sm:$0xff] }
 0x199   : > { %3393 = vmatpush3.bf16.msra.mxu1 %v3392_v13  ;;  %3397 = vmatprep.subr.bf16.mxu0 %v3703_v1 }
 0x19a   : > { %3406 = vmatprep.subr.bf16.mxu1 %v3703_v1 }
 0x19c   : > { %3162 = vmatmul.mubr.msk.f32.vlgmr.msra.gmra.mrb[14].mxu1 %vm1108_vm1, %v835_v31  ;;  %3399 = vmatpush3.bf16.msra.mxu0 %v3398_v23 }
 0x19d   : > { %3408 = vmatpush3.bf16.msra.mxu1 %v3407_v24  ;;  %3400 = vmatprep.subr.bf16.mxu0 %v3703_v1 }
 0x19e   : > { %3409 = vmatprep.subr.bf16.mxu1 %v3703_v1  ;;  %3199 = vmatprep.mubr.msk.f32.mxu1 %vm3704_vm0, %v3705_v21  ;;  %v3416_v21 = vpack.c.bf16 %v981_v47, %v980_v46  ;;  %vm801_vm0 = vcmp.ge.f32.partialorder %v783_v48, 0.0 }
 0x19f   : > { %v837_v51 = vsel %vm801_vm0, %v783_v48, %v819_v50 }
 0x1a0   : > { %3402 = vmatpush3.bf16.msra.mxu0 %v3401_v34 }
 0x1a1   : > { %3411 = vmatpush3.bf16.msra.mxu1 %v3410_v35  ;;  %3403 = vmatprep.subr.bf16.mxu0 %v3703_v1 }
 0x1a2   : > { %3412 = vmatprep.subr.bf16.mxu1 %v3703_v1 }
 0x1a4   : > { %3405 = vmatpush3.bf16.msra.mxu0 %v3404_v43 }
 0x1a5   : > { %3414 = vmatpush3.bf16.msra.mxu1 %v3413_v44 }
 0x1a6   : > { %3415 = vmatprep.subr.bf16.mxu1 %v3703_v1  ;;  %v2653_v1 = vld [vmem:[%s3986_s20 + $0x1] ss:$0 sm:$0xff] }
 0x1a7   : > { %3181 = vmatmul.mubr.msk.f32.vlgmr.msra.gmra.mrb[16].mxu0 %vm1108_vm1, %v836_v49 }
 0x1a9   : > { %3417 = vmatpush3.bf16.msra.mxu1 %v3416_v21  ;;  %v2667_v21 = vld [vmem:[%s3986_s20 + $0xf] ss:$0 sm:$0xff] }
 0x1ac   : > { %3200 = vmatmul.mubr.msk.f32.vlgmr.msra.gmra.mrb[16].mxu1 %vm1108_vm1, %v837_v51 }
 0x1fa   : > { %v1178_v53 = vpop.f32.mrb[0].mxu0 }
 0x1fb   : > { %v1179_v54 = vadd.f32 %v2652_v52, %v1178_v53  ;;  %v2878_v55 = vpop.f32.mrb[1].mxu0  ;;  %v2668_v52 = vld [vmem:[%s3986_s20 + $0x10] ss:$0 sm:$0xff] }
 0x1fd   : > { %2423 = vst [vmem:[%s4324_s8] sm:$0x3] %v1179_v54 }
 0x1fe   : > { %v1251_v56 = vpop.f32.mrb[0].mxu1 }
 0x1ff   : > { %v1252_v57 = vadd.f32 %v2653_v1, %v1251_v56  ;;  %v2897_v58 = vpop.f32.mrb[1].mxu1  ;;  %v2669_v1 = vld [vmem:[%s3986_s20 + $0x11] ss:$0 sm:$0xff] }
 0x201   : > { %2424 = vst [vmem:[%s4324_s8 + $0x2] sm:$0x3] %v1252_v57 }
 0x20a   : > { %v1324_v60 = vpop.f32.mrb[2].mxu0 }
 0x20b   : > { %v1325_v61 = vadd.f32 %v2654_v59, %v1324_v60  ;;  %v2916_v62 = vpop.f32.mrb[3].mxu0 }
 0x20d   : > { %2425 = vst [vmem:[%s4324_s8 + $0x4] sm:$0x3] %v1325_v61 }
 0x20f   : > { %v1397_v0 = vpop.f32.mrb[2].mxu1 }
 0x210   : > { %v1398_v2 = vadd.f32 %v2655_v63, %v1397_v0  ;;  %v2935_v3 = vpop.f32.mrb[3].mxu1 }
 0x212   : > { %2426 = vst [vmem:[%s4324_s8 + $0x6] sm:$0x3] %v1398_v2 }
 0x21a   : > { %v1470_v5 = vpop.f32.mrb[4].mxu0 }
 0x21b   : > { %v1471_v6 = vadd.f32 %v2656_v4, %v1470_v5  ;;  %v2954_v7 = vpop.f32.mrb[5].mxu0 }
 0x21d   : > { %2427 = vst [vmem:[%s4324_s8 + $0x8] sm:$0x3] %v1471_v6 }
 0x21f   : > { %v1543_v9 = vpop.f32.mrb[4].mxu1 }
 0x220   : > { %v1544_v10 = vadd.f32 %v2657_v8, %v1543_v9  ;;  %v2973_v11 = vpop.f32.mrb[5].mxu1 }
 0x222   : > { %2428 = vst [vmem:[%s4324_s8 + $0xa] sm:$0x3] %v1544_v10 }
 0x22a   : > { %v1616_v13 = vpop.f32.mrb[6].mxu0 }
 0x22b   : > { %v1617_v14 = vadd.f32 %v2658_v12, %v1616_v13  ;;  %v2992_v15 = vpop.f32.mrb[7].mxu0 }
 0x22d   : > { %2429 = vst [vmem:[%s4324_s8 + $0xc] sm:$0x3] %v1617_v14 }
 0x22f   : > { %v1689_v17 = vpop.f32.mrb[6].mxu1 }
 0x230   : > { %v1690_v18 = vadd.f32 %v2659_v16, %v1689_v17  ;;  %v3011_v19 = vpop.f32.mrb[7].mxu1 }
 0x232   : > { %2430 = vst [vmem:[%s4324_s8 + $0xe] sm:$0x3] %v1690_v18 }
 0x23a   : > { %v1762_v22 = vpop.f32.mrb[8].mxu0 }
 0x23b   : > { %v1763_v23 = vadd.f32 %v2660_v20, %v1762_v22  ;;  %v3030_v24 = vpop.f32.mrb[9].mxu0 }
 0x23d   : > { %2431 = vst [vmem:[%s4324_s8 + $0x10] sm:$0x3] %v1763_v23 }
 0x23f   : > { %v1835_v26 = vpop.f32.mrb[8].mxu1 }
 0x240   : > { %v1836_v27 = vadd.f32 %v2661_v25, %v1835_v26  ;;  %v3049_v28 = vpop.f32.mrb[9].mxu1 }
 0x242   : > { %2432 = vst [vmem:[%s4324_s8 + $0x12] sm:$0x3] %v1836_v27 }
 0x24a   : > { %v1908_v30 = vpop.f32.mrb[10].mxu0 }
 0x24b   : > { %v1909_v31 = vadd.f32 %v2662_v29, %v1908_v30  ;;  %v3068_v32 = vpop.f32.mrb[11].mxu0 }
 0x24d   : > { %2433 = vst [vmem:[%s4324_s8 + $0x14] sm:$0x3] %v1909_v31 }
 0x24f   : > { %v1981_v34 = vpop.f32.mrb[10].mxu1 }
 0x250   : > { %v1982_v35 = vadd.f32 %v2663_v33, %v1981_v34  ;;  %v3087_v36 = vpop.f32.mrb[11].mxu1 }
 0x252   : > { %2434 = vst [vmem:[%s4324_s8 + $0x16] sm:$0x3] %v1982_v35 }
 0x25a   : > { %v2054_v38 = vpop.f32.mrb[12].mxu0 }
 0x25b   : > { %v2055_v39 = vadd.f32 %v2664_v37, %v2054_v38  ;;  %v3106_v40 = vpop.f32.mrb[13].mxu0 }
 0x25d   : > { %2435 = vst [vmem:[%s4324_s8 + $0x18] sm:$0x3] %v2055_v39 }
 0x25f   : > { %v2127_v42 = vpop.f32.mrb[12].mxu1 }
 0x260   : > { %v2128_v43 = vadd.f32 %v2665_v41, %v2127_v42  ;;  %v3125_v44 = vpop.f32.mrb[13].mxu1 }
 0x262   : > { %2436 = vst [vmem:[%s4324_s8 + $0x1a] sm:$0x3] %v2128_v43 }
 0x26a   : > { %v2200_v46 = vpop.f32.mrb[14].mxu0 }
 0x26b   : > { %v2201_v47 = vadd.f32 %v2666_v45, %v2200_v46  ;;  %v3144_v48 = vpop.f32.mrb[15].mxu0 }
 0x26d   : > { %2437 = vst [vmem:[%s4324_s8 + $0x1c] sm:$0x3] %v2201_v47 }
 0x26f   : > { %v2273_v49 = vpop.f32.mrb[14].mxu1 }
 0x270   : > { %v2274_v50 = vadd.f32 %v2667_v21, %v2273_v49  ;;  %v3163_v51 = vpop.f32.mrb[15].mxu1 }
 0x272   : > { %2438 = vst [vmem:[%s4324_s8 + $0x1e] sm:$0x3] %v2274_v50 }
 0x27a   : > { %v2346_v53 = vpop.f32.mrb[16].mxu0 }
 0x27b   : > { %v2347_v54 = vadd.f32 %v2668_v52, %v2346_v53  ;;  %v3182_v55 = vpop.f32.mrb[17].mxu0 }
 0x27d   : > { %2439 = vst [vmem:[%s4324_s8 + $0x20] sm:$0x3] %v2347_v54 }
 0x27f   : > { %v2419_v56 = vpop.f32.mrb[16].mxu1 }
 0x280   : > { %v2420_v57 = vadd.f32 %v2669_v1, %v2419_v56  ;;  %v3201_v58 = vpop.f32.mrb[17].mxu1 }
 0x282   : > { %2440 = vst [vmem:[%s4324_s8 + $0x22] sm:$0x3] %v2420_v57 }
 0x283   : > { %3631 = shalt.err (!%p3628_p1)
}
 0x284   : > { %s3632_s17 = scalar_lea.hbm %s4365_s2, 576  ;;  %s3636_s20 = scalar_lea.hbm %s4417_s5, 1152 }
 0x285   : > { %p3633_p7 = scmp.ne.s32.totalorder %s4365_s2, %s3632_s17  ;;  %p3637_p2 = scmp.lt.u32.totalorder %s4365_s2, %s4417_s5 }
 0x286   : > { %p3638_p6 = scmp.lt.u32.totalorder %s3636_s20, %s3632_s17  ;;  %p3640_p0 = scmp.lt.u32.totalorder %s3632_s17, %s4365_s2 }
 0x287   : > { %p3634_p9 = pnand %p3633_p7, %p4445_p8 }
 0x288   : > { %p3639_p13 = por %p3638_p6, %p3637_p2 }
 0x289   : > { %p3635_p12 = pneg %p3634_p9 }
 0x28a   : > { %p3641_p10 = por %p3640_p0, %p3639_p13 }
 0x28c   : > { %p3642_p11 = pnand %p3641_p10, %p3635_p12 }
 0x28e   : > { %3645 = shalt.err (!%p3642_p11)
}
 0x28f   : > { %s3707_s12 = smov 32   ;;  %s3708_s7 = smov 2  }
 0x290   : > { %3433 = dma.vmem_to_hbm [thread:$0]  (%p4445_p8), %s4367_s13, 576, %s4365_s2, %s2442_s9, %s3707_s12, %s3707_s12, %s3708_s7  }
 0x291 PF: > { %s2470_s28 = sand.u32 1, %s3680_s18   ;;  %p4446_p4 = scmp.ne.s32.totalorder %s4434_s30, 0 }
 0x292   : > { %p4447_p3 = scmp.ge.s32.totalorder %s3692_s21, 2  ;;  %s2471_s24 = scalar_lea.sflag [#allocation4], %s2470_s28 }
 0x294   : > { %p3449_p5 = pnand %p4447_p3, %p4446_p4 }
 0x296   : > { %3675 = dma.done.wait (!%p3449_p5), %s2471_s24, 576  }
 0x297   : > { %3677 = vsyncadd (!%p3449_p5), %s2471_s24, 4294966720  ;;  %s4448_s21 = sld [smem:[#allocation16_spill]]  ;;  %s4449_s8 = sld [smem:[#allocation15_spill]] }
 0x298   : > { %s4450_s20 = sld [smem:[#allocation17_spill]]  ;;  %s4451_s18 = smov %s3684_s19 }
 0x29d   : > { %p24_p1 = scmp.ge.s32.totalorder %s4448_s21, 4   ;;  %s4452_s19 = smov %s4449_s8 }
 0x29f   :  { %26 = sbr.rel (!%p24_p1) target bundleno = 12 (0xc), region = 125 }
 0x2a6   :  { %2476 = vsyncpa [#allocation3], 1 }
 0x2a7   :  { %2478 = vsyncpa [#allocation3 + $0x1], 1 }
 0x2a8   :  { %2479 = vsyncpa [#allocation6], 1 }
 0x2a9   :  { %2481 = vsyncpa [#allocation6 + $0x1], 1 }
 0x2aa   :  { %2482 = vsyncpa [#allocation9], 1 }
 0x2ab   :  { %2484 = vsyncpa [#allocation9 + $0x1], 1 }
 0x2ac   :  { %2485 = vsyncpa [#allocation4], 1 }
 0x2ad   :  { %2487 = vsyncpa [#allocation4 + $0x1], 1 }

</bundles_post_ra>
